<compile_context>
chip_gen: v7x
topology: tpu7x:2x2x1
jax: 0.10.0
libtpu: 0.0.40
codegen_flags: <defaults>
</compile_context>

<pallas_src>
import math
import jax
import jax.numpy as jnp
from jax.experimental import pallas as pl
from jax.experimental.pallas import tpu as pltpu

# ---- small config consistent with the module's __init__ knobs -------------
VOCAB = 64          # len(vocab)
MAX_POS = 16        # max position embeddings
B = 2               # batch
S = 8               # max_sent_length
T = B * S           # folded token axis
H = 32              # hidden_size == embedding_size
NH = 4              # num_attention_heads
DH = H // NH
INTER = 64          # intermediate_size
NUM_LAYERS = 2      # num_layers
NUM_LABELS = 2      # num_classes
EPS = 1e-12
NEG = -10000.0      # additive mask value, as in BERT

# ---- packed-slab layouts (static offsets shared by host packer and kernel) ----
# data slab: (T, 128) f32
DCOL_IDS = 0                               # lane 0: token ids (as f32, exact for small ints)
DCOL_SEG = 1                               # lane 1: segment ids
DCOL_MASK = 8                              # lanes [8, 8+T): full (T,T) additive attention mask

# f32 parameter slab: (F_ROWS, 128)
OFF_WORD = 0                               # VOCAB rows, lanes [0,H)
OFF_TYPE = OFF_WORD + VOCAB                # 2 rows
OFF_POS = 72                               # T rows (8-aligned)
OFF_EMB_G = OFF_POS + T                    # 1 row
OFF_EMB_B = OFF_EMB_G + 1                  # 1 row
OFF_LAYER_F = 96                           # per-layer block of LROWS_F rows (8-aligned)
LROWS_F = 8                                # [bqkv, bo, g1, b1, bi, b2, g2, b2b]
OFF_BP = OFF_LAYER_F + NUM_LAYERS * LROWS_F
OFF_BC = OFF_BP + 1
F_ROWS = 120

# bf16 matmul-weight slab: (W_ROWS, 128)
W_QKV = 0                                  # H rows, lanes [0,3H)
W_O = H                                    # H rows, lanes [0,H)
W_I = 2 * H                                # H rows, lanes [0,INTER)
W_2 = 3 * H                                # INTER rows, lanes [0,H)
LROWS_W = 3 * H + INTER                    # 160 rows per layer (16-aligned)
OFF_WP = NUM_LAYERS * LROWS_W              # H rows
OFF_WC = OFF_WP + H                        # H rows, lanes [0,NUM_LABELS)
W_ROWS = OFF_WC + H                        # 384


def _layer_norm(x, gamma, beta):
    mu = jnp.mean(x, axis=-1, keepdims=True)
    var = jnp.mean((x - mu) ** 2, axis=-1, keepdims=True)
    return (x - mu) * jax.lax.rsqrt(var + EPS) * gamma + beta


# ----------------------------- fused kernel ---------------------------------

def fused_forward_kernel(data_ref, f_ref, w_ref, out_ref):
    f32 = jnp.float32
    bf16 = jnp.bfloat16

    data = data_ref[...]                                   # (T, 128) f32, one full-tile load
    ids = data[:, DCOL_IDS:DCOL_IDS + 1]                   # (T, 1)
    seg = data[:, DCOL_SEG:DCOL_SEG + 1]                   # (T, 1)
    mask = data[:, DCOL_MASK:DCOL_MASK + T]                # (T, T) additive (padding + block-diag)

    # ---- embeddings: word (one-hot matmul gather) + position + token type ----
    word_emb = f_ref[OFF_WORD:OFF_WORD + VOCAB, 0:H]       # (VOCAB, H)
    type_emb = f_ref[OFF_TYPE:OFF_TYPE + 2, 0:H]           # (2, H)
    pos_rows = f_ref[OFF_POS:OFF_POS + T, 0:H]             # (T, H)
    emb_g = f_ref[OFF_EMB_G:OFF_EMB_G + 1, 0:H]
    emb_b = f_ref[OFF_EMB_B:OFF_EMB_B + 1, 0:H]

    vocab_iota = jax.lax.broadcasted_iota(jnp.int32, (T, VOCAB), 1)
    onehot = (vocab_iota == ids.astype(jnp.int32)).astype(f32)         # (T, VOCAB)
    word = jnp.dot(onehot, word_emb, preferred_element_type=f32)       # (T, H)
    type0 = type_emb[0:1, :]
    type1 = type_emb[1:2, :]
    tok_type = type0 + seg * (type1 - type0)                           # exact for seg in {0,1}
    x = _layer_norm(word + pos_rows + tok_type, emb_g, emb_b)          # (T, H) f32

    # ---- encoder layers (residual stream stays resident in VMEM) ----
    for l in range(NUM_LAYERS):
        fb = OFF_LAYER_F + l * LROWS_F
        wb = l * LROWS_W
        bqkv = f_ref[fb + 0:fb + 1, 0:3 * H]               # (1, 3H); q part pre-scaled
        bo = f_ref[fb + 1:fb + 2, 0:H]
        g1 = f_ref[fb + 2:fb + 3, 0:H]
        b1 = f_ref[fb + 3:fb + 4, 0:H]
        bi = f_ref[fb + 4:fb + 5, 0:INTER]
        b2 = f_ref[fb + 5:fb + 6, 0:H]
        g2 = f_ref[fb + 6:fb + 7, 0:H]
        b2b = f_ref[fb + 7:fb + 8, 0:H]

        wqkv = w_ref[wb + W_QKV:wb + W_QKV + H, 0:3 * H]   # (H, 3H) bf16, q cols pre-scaled
        wo = w_ref[wb + W_O:wb + W_O + H, 0:H]             # (H, H)
        wi = w_ref[wb + W_I:wb + W_I + H, 0:INTER]         # (H, INTER)
        w2 = w_ref[wb + W_2:wb + W_2 + INTER, 0:H]         # (INTER, H)

        xb = x.astype(bf16)
        # Single fused QKV projection: one (T,H)x(H,3H) MXU pass instead of 12 DH-wide dots.
        qkv = jnp.dot(xb, wqkv, preferred_element_type=f32) + bqkv     # (T, 3H) f32

        ctx_heads = []
        for h in range(NH):                                # static unroll; lane slices only
            q = qkv[:, h * DH:(h + 1) * DH].astype(bf16)
            k = qkv[:, H + h * DH:H + (h + 1) * DH].astype(bf16)
            v = qkv[:, 2 * H + h * DH:2 * H + (h + 1) * DH].astype(bf16)
            s = jax.lax.dot_general(q, k, (((1,), (1,)), ((), ())),
                                    preferred_element_type=f32) + mask   # (T, T)
            m = jnp.max(s, axis=-1, keepdims=True)
            p = jnp.exp(s - m)
            p = p * pl.reciprocal(jnp.sum(p, axis=-1, keepdims=True), approx=True)
            ctx_heads.append(jnp.dot(p.astype(bf16), v, preferred_element_type=f32))
        ctx = jnp.concatenate(ctx_heads, axis=-1)          # (T, H): cheap lane concat
        attn = jnp.dot(ctx.astype(bf16), wo, preferred_element_type=f32) + bo   # single output dot
        x1 = _layer_norm(x + attn, g1, b1)

        inter = jnp.maximum(jnp.dot(x1.astype(bf16), wi, preferred_element_type=f32) + bi, 0.0)
        ffn = jnp.dot(inter.astype(bf16), w2, preferred_element_type=f32) + b2
        x = _layer_norm(x1 + ffn, g2, b2b)

    # ---- pooler + classifier on ALL rows (free); host selects the CLS rows ----
    wp = w_ref[OFF_WP:OFF_WP + H, 0:H]
    wc = w_ref[OFF_WC:OFF_WC + H, 0:NUM_LABELS]
    bp = f_ref[OFF_BP:OFF_BP + 1, 0:H]
    bc = f_ref[OFF_BC:OFF_BC + 1, 0:NUM_LABELS]
    pooled = jnp.tanh(jnp.dot(x.astype(bf16), wp, preferred_element_type=f32) + bp)    # (T, H)
    out_ref[...] = jnp.dot(pooled.astype(bf16), wc, preferred_element_type=f32) + bc   # (T, NUM_LABELS)


# ------------------------ host-side packing ----------------------------------

def _pad_lanes(m):
    m = jnp.asarray(m, jnp.float32)
    return jnp.pad(m, ((0, 0), (0, 128 - m.shape[1])))


def pack_params(p):
    """Pack all parameters into one f32 slab (biases / LN / embedding tables) and one
    bf16 slab (matmul weights, QKV fused, attention scale folded into q)."""
    scale = 1.0 / math.sqrt(DH)
    zrows = lambda n: jnp.zeros((n, 128), jnp.float32)

    f_parts = [
        _pad_lanes(p["word_emb"]),                           # OFF_WORD
        _pad_lanes(p["type_emb"]),                           # OFF_TYPE
        zrows(OFF_POS - (OFF_TYPE + 2)),
        _pad_lanes(jnp.tile(p["pos_emb"][:S], (B, 1))),      # OFF_POS: static pos rows over batch
        _pad_lanes(p["emb_ln_g"]), _pad_lanes(p["emb_ln_b"]),
        zrows(OFF_LAYER_F - (OFF_EMB_B + 1)),
    ]
    w_parts = []
    for (wq, bq, wk, bk, wv, bv, wo, bo, g1, b1, wi, bi, w2, b2, g2, b2b) in p["layers"]:
        bqkv = jnp.concatenate([bq * scale, bk, bv], axis=1)        # (1, 3H)
        f_parts += [_pad_lanes(bqkv), _pad_lanes(bo), _pad_lanes(g1), _pad_lanes(b1),
                    _pad_lanes(bi), _pad_lanes(b2), _pad_lanes(g2), _pad_lanes(b2b)]
        wqkv = jnp.concatenate([wq * scale, wk, wv], axis=1)        # (H, 3H)
        w_parts += [_pad_lanes(wqkv), _pad_lanes(wo), _pad_lanes(wi), _pad_lanes(w2)]
    f_parts += [_pad_lanes(p["bp"]), _pad_lanes(p["bc"])]
    w_parts += [_pad_lanes(p["wp"]), _pad_lanes(p["wc"])]

    f_slab = jnp.concatenate(f_parts, axis=0)
    f_slab = jnp.pad(f_slab, ((0, F_ROWS - f_slab.shape[0]), (0, 0)))
    w_slab = jnp.concatenate(w_parts, axis=0).astype(jnp.bfloat16)
    assert f_slab.shape == (F_ROWS, 128) and w_slab.shape == (W_ROWS, 128)
    return f_slab, w_slab


def pack_inputs(input_ids, segment_ids, input_mask):
    """Pack per-call inputs (ids, segment ids, attention mask) into one (T,128) f32 tile."""
    ids = input_ids.reshape(T).astype(jnp.float32)
    seg = segment_ids.reshape(T).astype(jnp.float32)
    # Combined additive attention mask over the folded (B*S) token axis:
    # padding mask (1-mask)*NEG for keys, plus NEG for cross-sequence pairs so folded
    # batches cannot attend each other.
    add_mask = ((1.0 - input_mask.astype(jnp.float32)) * NEG).reshape(T)
    same_seq = (jnp.arange(T)[:, None] // S) == (jnp.arange(T)[None, :] // S)
    full_mask = jnp.where(same_seq, add_mask[None, :], NEG).astype(jnp.float32)   # (T, T)

    data = jnp.zeros((T, 128), jnp.float32)
    data = data.at[:, DCOL_IDS].set(ids)
    data = data.at[:, DCOL_SEG].set(seg)
    data = data.at[:, DCOL_MASK:DCOL_MASK + T].set(full_mask)
    return data


# --------------------------- full forward pass -------------------------------

def transformer_forward(input_ids, segment_ids, input_mask, f_slab, w_slab):
    data = pack_inputs(input_ids, segment_ids, input_mask)

    vmem = pl.BlockSpec(memory_space=pltpu.MemorySpace.VMEM)
    logits_all = pl.pallas_call(
        fused_forward_kernel,
        out_shape=jax.ShapeDtypeStruct((T, NUM_LABELS), jnp.float32),
        in_specs=[vmem, vmem, vmem],      # 3 packed slabs -> 3 DMAs; everything resident in VMEM
        out_specs=vmem,
        compiler_params=pltpu.CompilerParams(
            # Total footprint ~200 KiB; explicit, generous scoped-VMEM budget.
            # Re-derive against 64 MiB physical VMEM if scaling up on v7x.
            vmem_limit_bytes=32 * 1024 * 1024,
        ),
    )(data, f_slab, w_slab)

    logits = logits_all.reshape(B, S, NUM_LABELS)[:, 0, :]   # CLS row of each sequence
    preds = jnp.argmax(logits, axis=1)
    return logits, preds


# --------------------------- parameters (synthetic) --------------------------

def init_params(key):
    std = 0.02
    keys = jax.random.split(key, 8 + NUM_LAYERS)
    p = {
        "word_emb": jax.random.normal(keys[0], (VOCAB, H), jnp.float32) * std,
        "pos_emb": jax.random.normal(keys[1], (MAX_POS, H), jnp.float32) * std,
        "type_emb": jax.random.normal(keys[2], (2, H), jnp.float32) * std,
        "emb_ln_g": jnp.ones((1, H), jnp.float32),
        "emb_ln_b": jnp.zeros((1, H), jnp.float32),
        "wp": jax.random.normal(keys[3], (H, H), jnp.float32) * std,
        "bp": jnp.zeros((1, H), jnp.float32),
        "wc": jax.random.normal(keys[4], (H, NUM_LABELS), jnp.float32) * std,
        "bc": jnp.zeros((1, NUM_LABELS), jnp.float32),
        "layers": [],
    }
    for l in range(NUM_LAYERS):
        lk = jax.random.split(keys[8 + l], 6)
        layer = (
            jax.random.normal(lk[0], (H, H), jnp.float32) * std, jnp.zeros((1, H)),          # wq, bq
            jax.random.normal(lk[1], (H, H), jnp.float32) * std, jnp.zeros((1, H)),          # wk, bk
            jax.random.normal(lk[2], (H, H), jnp.float32) * std, jnp.zeros((1, H)),          # wv, bv
            jax.random.normal(lk[3], (H, H), jnp.float32) * std, jnp.zeros((1, H)),          # wo, bo
            jnp.ones((1, H)), jnp.zeros((1, H)),                                             # LN1
            jax.random.normal(lk[4], (H, INTER), jnp.float32) * std, jnp.zeros((1, INTER)),  # wi, bi
            jax.random.normal(lk[5], (INTER, H), jnp.float32) * std, jnp.zeros((1, H)),      # w2, b2
            jnp.ones((1, H)), jnp.zeros((1, H)),                                             # LN2
        )
        p["layers"].append(layer)
    return p


# ------------------------- pure-JAX f32 reference ----------------------------

def reference_forward(input_ids, segment_ids, input_mask, params):
    def ln(x, g, b):
        mu = x.mean(-1, keepdims=True)
        var = ((x - mu) ** 2).mean(-1, keepdims=True)
        return (x - mu) * jax.lax.rsqrt(var + EPS) * g + b

    positions = jnp.arange(S)
    emb = (params["word_emb"][input_ids]
           + params["pos_emb"][positions][None, :, :]
           + params["type_emb"][segment_ids])
    x = ln(emb, params["emb_ln_g"], params["emb_ln_b"])
    ext = ((1.0 - input_mask.astype(jnp.float32)) * NEG)[:, None, :]   # (B, 1, S)

    for (wq, bq, wk, bk, wv, bv, wo, bo, g1, b1, wi, bi, w2, b2, g2, b2b) in params["layers"]:
        q, k, v = x @ wq + bq, x @ wk + bk, x @ wv + bv

        def heads(t):
            return t.reshape(B, S, NH, DH).transpose(0, 2, 1, 3)

        qh, kh, vh = heads(q), heads(k), heads(v)
        sc = jnp.einsum("bhqd,bhkd->bhqk", qh, kh) / math.sqrt(DH) + ext[:, None]
        p_ = jax.nn.softmax(sc, axis=-1)
        ctx = jnp.einsum("bhqk,bhkd->bhqd", p_, vh).transpose(0, 2, 1, 3).reshape(B, S, H)
        x1 = ln(x + ctx @ wo + bo, g1, b1)
        ffn = jnp.maximum(x1 @ wi + bi, 0.0) @ w2 + b2
        x = ln(x1 + ffn, g2, b2b)

    cls = x[:, 0, :]
    pooled = jnp.tanh(cls @ params["wp"] + params["bp"])
    return pooled @ params["wc"] + params["bc"]


if __name__ == "__main__":
    key = jax.random.PRNGKey(0)
    k_ids, k_params = jax.random.split(key)

    input_ids = jax.random.randint(k_ids, (B, S), 0, VOCAB, dtype=jnp.int32)
    # Exercise token types: second half of each sequence is segment 1.
    segment_ids = jnp.zeros((B, S), jnp.int32).at[:, S // 2:].set(1)
    # Mask out the last two positions of the second example to exercise masking.
    input_mask = jnp.ones((B, S), jnp.int32).at[1, S - 2:].set(0)

    params = init_params(k_params)
    f_slab, w_slab = pack_params(params)

    fwd = jax.jit(transformer_forward)
    logits, preds = fwd(input_ids, segment_ids, input_mask, f_slab, w_slab)
    jax.block_until_ready((logits, preds))

    assert logits.shape == (B, NUM_LABELS)
    assert preds.shape == (B,)

    # Loose tolerance: kernel runs MXU matmuls in bf16 + approx-reciprocal softmax.
    ref_logits = reference_forward(input_ids, segment_ids, input_mask, params)
    assert jnp.allclose(logits, ref_logits, atol=2e-2), (logits, ref_logits)

    print("KERNEL_OK")
</pallas_src>

<mosaic_0001>
module attributes {stable_mosaic.version = 11 : i64} {
  func.func @fused_forward_kernel(%arg0: memref<16x128xf32, #tpu.memory_space<vmem>>, %arg1: memref<120x128xf32, #tpu.memory_space<vmem>>, %arg2: memref<384x128xbf16, #tpu.memory_space<vmem>>, %arg3: memref<16x2xf32, #tpu.memory_space<vmem>>) attributes {dimension_semantics = [], scalar_prefetch = 0 : i64, scratch_operands = 0 : i64, tpu.core_type = #tpu.core_type<tc>} {
    %c0 = arith.constant 0 : index
    %c0_0 = arith.constant 0 : index
    %0 = vector.load %arg0[%c0, %c0_0] : memref<16x128xf32, #tpu.memory_space<vmem>>, vector<16x128xf32>
    %1 = vector.extract_strided_slice %0 {offsets = [0, 0], sizes = [16, 1], strides = [1, 1]} : vector<16x128xf32> to vector<16x1xf32>
    %2 = vector.extract_strided_slice %0 {offsets = [0, 1], sizes = [16, 1], strides = [1, 1]} : vector<16x128xf32> to vector<16x1xf32>
    %3 = vector.extract_strided_slice %0 {offsets = [0, 8], sizes = [16, 16], strides = [1, 1]} : vector<16x128xf32> to vector<16x16xf32>
    %c0_1 = arith.constant 0 : index
    %c0_2 = arith.constant 0 : index
    %4 = vector.load %arg1[%c0_1, %c0_2] : memref<120x128xf32, #tpu.memory_space<vmem>>, vector<64x32xf32>
    %c64 = arith.constant 64 : index
    %c0_3 = arith.constant 0 : index
    %5 = vector.load %arg1[%c64, %c0_3] : memref<120x128xf32, #tpu.memory_space<vmem>>, vector<2x32xf32>
    %c72 = arith.constant 72 : index
    %c0_4 = arith.constant 0 : index
    %6 = vector.load %arg1[%c72, %c0_4] : memref<120x128xf32, #tpu.memory_space<vmem>>, vector<16x32xf32>
    %c88 = arith.constant 88 : index
    %c0_5 = arith.constant 0 : index
    %7 = vector.load %arg1[%c88, %c0_5] : memref<120x128xf32, #tpu.memory_space<vmem>>, vector<1x32xf32>
    %c89 = arith.constant 89 : index
    %c0_6 = arith.constant 0 : index
    %8 = vector.load %arg1[%c89, %c0_6] : memref<120x128xf32, #tpu.memory_space<vmem>>, vector<1x32xf32>
    %9 = tpu.iota {dimensions = array<i32: 1>} : vector<16x64xi32>
    %10 = arith.fptosi %1 : vector<16x1xf32> to vector<16x1xi32>
    %11 = vector.broadcast %10 : vector<16x1xi32> to vector<16x64xi32>
    %12 = arith.cmpi eq, %9, %11 : vector<16x64xi32>
    %13 = arith.extui %12 : vector<16x64xi1> to vector<16x64xi32>
    %14 = arith.sitofp %13 : vector<16x64xi32> to vector<16x64xf32>
    %cst = arith.constant dense<0.000000e+00> : vector<16x32xf32>
    %15 = tpu.matmul %14, %4, %cst {dimension_numbers = #tpu.dot_dimension_numbers<[1], [0], [0], [1], [0, 0, 1, 1], [], []>} : vector<16x64xf32>, vector<64x32xf32>, vector<16x32xf32> -> vector<16x32xf32>
    %16 = vector.extract_strided_slice %5 {offsets = [0, 0], sizes = [1, 32], strides = [1, 1]} : vector<2x32xf32> to vector<1x32xf32>
    %17 = vector.extract_strided_slice %5 {offsets = [1, 0], sizes = [1, 32], strides = [1, 1]} : vector<2x32xf32> to vector<1x32xf32>
    %18 = arith.subf %17, %16 : vector<1x32xf32>
    %19 = vector.broadcast %2 : vector<16x1xf32> to vector<16x32xf32>
    %20 = vector.broadcast %18 : vector<1x32xf32> to vector<16x32xf32>
    %21 = arith.mulf %19, %20 : vector<16x32xf32>
    %22 = vector.broadcast %16 : vector<1x32xf32> to vector<16x32xf32>
    %23 = arith.addf %22, %21 : vector<16x32xf32>
    %24 = arith.addf %15, %6 : vector<16x32xf32>
    %25 = arith.addf %24, %23 : vector<16x32xf32>
    %cst_7 = arith.constant dense<0.000000e+00> : vector<16xf32>
    %26 = vector.multi_reduction <add>, %25, %cst_7 [1] : vector<16x32xf32> to vector<16xf32>
    %27 = vector.shape_cast %26 : vector<16xf32> to vector<16x1xf32>
    %cst_8 = arith.constant 3.200000e+01 : f32
    %28 = vector.broadcast %cst_8 : f32 to vector<16x1xf32>
    %29 = arith.divf %27, %28 : vector<16x1xf32>
    %30 = vector.broadcast %29 : vector<16x1xf32> to vector<16x32xf32>
    %31 = arith.subf %25, %30 : vector<16x32xf32>
    %32 = arith.mulf %31, %31 : vector<16x32xf32>
    %cst_9 = arith.constant dense<0.000000e+00> : vector<16xf32>
    %33 = vector.multi_reduction <add>, %32, %cst_9 [1] : vector<16x32xf32> to vector<16xf32>
    %34 = vector.shape_cast %33 : vector<16xf32> to vector<16x1xf32>
    %cst_10 = arith.constant 3.200000e+01 : f32
    %35 = vector.broadcast %cst_10 : f32 to vector<16x1xf32>
    %36 = arith.divf %34, %35 : vector<16x1xf32>
    %37 = vector.broadcast %29 : vector<16x1xf32> to vector<16x32xf32>
    %38 = arith.subf %25, %37 : vector<16x32xf32>
    %cst_11 = arith.constant 9.99999996E-13 : f32
    %39 = vector.broadcast %cst_11 : f32 to vector<16x1xf32>
    %40 = arith.addf %36, %39 : vector<16x1xf32>
    %41 = math.rsqrt %40 : vector<16x1xf32>
    %42 = vector.broadcast %41 : vector<16x1xf32> to vector<16x32xf32>
    %43 = arith.mulf %38, %42 : vector<16x32xf32>
    %44 = vector.broadcast %7 : vector<1x32xf32> to vector<16x32xf32>
    %45 = arith.mulf %43, %44 : vector<16x32xf32>
    %46 = vector.broadcast %8 : vector<1x32xf32> to vector<16x32xf32>
    %47 = arith.addf %45, %46 : vector<16x32xf32>
    %c96 = arith.constant 96 : index
    %c0_12 = arith.constant 0 : index
    %48 = vector.load %arg1[%c96, %c0_12] : memref<120x128xf32, #tpu.memory_space<vmem>>, vector<1x96xf32>
    %c97 = arith.constant 97 : index
    %c0_13 = arith.constant 0 : index
    %49 = vector.load %arg1[%c97, %c0_13] : memref<120x128xf32, #tpu.memory_space<vmem>>, vector<1x32xf32>
    %c98 = arith.constant 98 : index
    %c0_14 = arith.constant 0 : index
    %50 = vector.load %arg1[%c98, %c0_14] : memref<120x128xf32, #tpu.memory_space<vmem>>, vector<1x32xf32>
    %c99 = arith.constant 99 : index
    %c0_15 = arith.constant 0 : index
    %51 = vector.load %arg1[%c99, %c0_15] : memref<120x128xf32, #tpu.memory_space<vmem>>, vector<1x32xf32>
    %c100 = arith.constant 100 : index
    %c0_16 = arith.constant 0 : index
    %52 = vector.load %arg1[%c100, %c0_16] : memref<120x128xf32, #tpu.memory_space<vmem>>, vector<1x64xf32>
    %c101 = arith.constant 101 : index
    %c0_17 = arith.constant 0 : index
    %53 = vector.load %arg1[%c101, %c0_17] : memref<120x128xf32, #tpu.memory_space<vmem>>, vector<1x32xf32>
    %c102 = arith.constant 102 : index
    %c0_18 = arith.constant 0 : index
    %54 = vector.load %arg1[%c102, %c0_18] : memref<120x128xf32, #tpu.memory_space<vmem>>, vector<1x32xf32>
    %c103 = arith.constant 103 : index
    %c0_19 = arith.constant 0 : index
    %55 = vector.load %arg1[%c103, %c0_19] : memref<120x128xf32, #tpu.memory_space<vmem>>, vector<1x32xf32>
    %c0_20 = arith.constant 0 : index
    %c0_21 = arith.constant 0 : index
    %56 = vector.load %arg2[%c0_20, %c0_21] : memref<384x128xbf16, #tpu.memory_space<vmem>>, vector<32x96xbf16>
    %c32 = arith.constant 32 : index
    %c0_22 = arith.constant 0 : index
    %57 = vector.load %arg2[%c32, %c0_22] : memref<384x128xbf16, #tpu.memory_space<vmem>>, vector<32x32xbf16>
    %c64_23 = arith.constant 64 : index
    %c0_24 = arith.constant 0 : index
    %58 = vector.load %arg2[%c64_23, %c0_24] : memref<384x128xbf16, #tpu.memory_space<vmem>>, vector<32x64xbf16>
    %c96_25 = arith.constant 96 : index
    %c0_26 = arith.constant 0 : index
    %59 = vector.load %arg2[%c96_25, %c0_26] : memref<384x128xbf16, #tpu.memory_space<vmem>>, vector<64x32xbf16>
    %60 = arith.truncf %47 : vector<16x32xf32> to vector<16x32xbf16>
    %cst_27 = arith.constant dense<0.000000e+00> : vector<16x96xf32>
    %61 = tpu.matmul %60, %56, %cst_27 {dimension_numbers = #tpu.dot_dimension_numbers<[1], [0], [0], [1], [0, 0, 1, 1], [], []>} : vector<16x32xbf16>, vector<32x96xbf16>, vector<16x96xf32> -> vector<16x96xf32>
    %62 = vector.broadcast %48 : vector<1x96xf32> to vector<16x96xf32>
    %63 = arith.addf %61, %62 : vector<16x96xf32>
    %64 = vector.extract_strided_slice %63 {offsets = [0, 0], sizes = [16, 8], strides = [1, 1]} : vector<16x96xf32> to vector<16x8xf32>
    %65 = arith.truncf %64 : vector<16x8xf32> to vector<16x8xbf16>
    %66 = vector.extract_strided_slice %63 {offsets = [0, 32], sizes = [16, 8], strides = [1, 1]} : vector<16x96xf32> to vector<16x8xf32>
    %67 = arith.truncf %66 : vector<16x8xf32> to vector<16x8xbf16>
    %68 = vector.extract_strided_slice %63 {offsets = [0, 64], sizes = [16, 8], strides = [1, 1]} : vector<16x96xf32> to vector<16x8xf32>
    %69 = arith.truncf %68 : vector<16x8xf32> to vector<16x8xbf16>
    %cst_28 = arith.constant dense<0.000000e+00> : vector<16x16xf32>
    %70 = tpu.matmul %65, %67, %cst_28 {dimension_numbers = #tpu.dot_dimension_numbers<[1], [1], [0], [0], [0, 0, 1, 0], [], []>} : vector<16x8xbf16>, vector<16x8xbf16>, vector<16x16xf32> -> vector<16x16xf32>
    %71 = arith.addf %70, %3 : vector<16x16xf32>
    %cst_29 = arith.constant dense<0xFF800000> : vector<16xf32>
    %72 = vector.multi_reduction <maximumf>, %71, %cst_29 [1] : vector<16x16xf32> to vector<16xf32>
    %73 = vector.shape_cast %72 : vector<16xf32> to vector<16x1xf32>
    %74 = vector.broadcast %73 : vector<16x1xf32> to vector<16x16xf32>
    %75 = arith.subf %71, %74 : vector<16x16xf32>
    %76 = math.exp %75 : vector<16x16xf32>
    %cst_30 = arith.constant dense<0.000000e+00> : vector<16xf32>
    %77 = vector.multi_reduction <add>, %76, %cst_30 [1] : vector<16x16xf32> to vector<16xf32>
    %78 = vector.shape_cast %77 : vector<16xf32> to vector<16x1xf32>
    %79 = tpu.reciprocal %78 {approx = true} : vector<16x1xf32> -> vector<16x1xf32>
    %80 = vector.broadcast %79 : vector<16x1xf32> to vector<16x16xf32>
    %81 = arith.mulf %76, %80 : vector<16x16xf32>
    %82 = arith.truncf %81 : vector<16x16xf32> to vector<16x16xbf16>
    %cst_31 = arith.constant dense<0.000000e+00> : vector<16x8xf32>
    %83 = tpu.matmul %82, %69, %cst_31 {dimension_numbers = #tpu.dot_dimension_numbers<[1], [0], [0], [1], [0, 0, 1, 1], [], []>} : vector<16x16xbf16>, vector<16x8xbf16>, vector<16x8xf32> -> vector<16x8xf32>
    %84 = vector.extract_strided_slice %63 {offsets = [0, 8], sizes = [16, 8], strides = [1, 1]} : vector<16x96xf32> to vector<16x8xf32>
    %85 = arith.truncf %84 : vector<16x8xf32> to vector<16x8xbf16>
    %86 = vector.extract_strided_slice %63 {offsets = [0, 40], sizes = [16, 8], strides = [1, 1]} : vector<16x96xf32> to vector<16x8xf32>
    %87 = arith.truncf %86 : vector<16x8xf32> to vector<16x8xbf16>
    %88 = vector.extract_strided_slice %63 {offsets = [0, 72], sizes = [16, 8], strides = [1, 1]} : vector<16x96xf32> to vector<16x8xf32>
    %89 = arith.truncf %88 : vector<16x8xf32> to vector<16x8xbf16>
    %cst_32 = arith.constant dense<0.000000e+00> : vector<16x16xf32>
    %90 = tpu.matmul %85, %87, %cst_32 {dimension_numbers = #tpu.dot_dimension_numbers<[1], [1], [0], [0], [0, 0, 1, 0], [], []>} : vector<16x8xbf16>, vector<16x8xbf16>, vector<16x16xf32> -> vector<16x16xf32>
    %91 = arith.addf %90, %3 : vector<16x16xf32>
    %cst_33 = arith.constant dense<0xFF800000> : vector<16xf32>
    %92 = vector.multi_reduction <maximumf>, %91, %cst_33 [1] : vector<16x16xf32> to vector<16xf32>
    %93 = vector.shape_cast %92 : vector<16xf32> to vector<16x1xf32>
    %94 = vector.broadcast %93 : vector<16x1xf32> to vector<16x16xf32>
    %95 = arith.subf %91, %94 : vector<16x16xf32>
    %96 = math.exp %95 : vector<16x16xf32>
    %cst_34 = arith.constant dense<0.000000e+00> : vector<16xf32>
    %97 = vector.multi_reduction <add>, %96, %cst_34 [1] : vector<16x16xf32> to vector<16xf32>
    %98 = vector.shape_cast %97 : vector<16xf32> to vector<16x1xf32>
    %99 = tpu.reciprocal %98 {approx = true} : vector<16x1xf32> -> vector<16x1xf32>
    %100 = vector.broadcast %99 : vector<16x1xf32> to vector<16x16xf32>
    %101 = arith.mulf %96, %100 : vector<16x16xf32>
    %102 = arith.truncf %101 : vector<16x16xf32> to vector<16x16xbf16>
    %cst_35 = arith.constant dense<0.000000e+00> : vector<16x8xf32>
    %103 = tpu.matmul %102, %89, %cst_35 {dimension_numbers = #tpu.dot_dimension_numbers<[1], [0], [0], [1], [0, 0, 1, 1], [], []>} : vector<16x16xbf16>, vector<16x8xbf16>, vector<16x8xf32> -> vector<16x8xf32>
    %104 = vector.extract_strided_slice %63 {offsets = [0, 16], sizes = [16, 8], strides = [1, 1]} : vector<16x96xf32> to vector<16x8xf32>
    %105 = arith.truncf %104 : vector<16x8xf32> to vector<16x8xbf16>
    %106 = vector.extract_strided_slice %63 {offsets = [0, 48], sizes = [16, 8], strides = [1, 1]} : vector<16x96xf32> to vector<16x8xf32>
    %107 = arith.truncf %106 : vector<16x8xf32> to vector<16x8xbf16>
    %108 = vector.extract_strided_slice %63 {offsets = [0, 80], sizes = [16, 8], strides = [1, 1]} : vector<16x96xf32> to vector<16x8xf32>
    %109 = arith.truncf %108 : vector<16x8xf32> to vector<16x8xbf16>
    %cst_36 = arith.constant dense<0.000000e+00> : vector<16x16xf32>
    %110 = tpu.matmul %105, %107, %cst_36 {dimension_numbers = #tpu.dot_dimension_numbers<[1], [1], [0], [0], [0, 0, 1, 0], [], []>} : vector<16x8xbf16>, vector<16x8xbf16>, vector<16x16xf32> -> vector<16x16xf32>
    %111 = arith.addf %110, %3 : vector<16x16xf32>
    %cst_37 = arith.constant dense<0xFF800000> : vector<16xf32>
    %112 = vector.multi_reduction <maximumf>, %111, %cst_37 [1] : vector<16x16xf32> to vector<16xf32>
    %113 = vector.shape_cast %112 : vector<16xf32> to vector<16x1xf32>
    %114 = vector.broadcast %113 : vector<16x1xf32> to vector<16x16xf32>
    %115 = arith.subf %111, %114 : vector<16x16xf32>
    %116 = math.exp %115 : vector<16x16xf32>
    %cst_38 = arith.constant dense<0.000000e+00> : vector<16xf32>
    %117 = vector.multi_reduction <add>, %116, %cst_38 [1] : vector<16x16xf32> to vector<16xf32>
    %118 = vector.shape_cast %117 : vector<16xf32> to vector<16x1xf32>
    %119 = tpu.reciprocal %118 {approx = true} : vector<16x1xf32> -> vector<16x1xf32>
    %120 = vector.broadcast %119 : vector<16x1xf32> to vector<16x16xf32>
    %121 = arith.mulf %116, %120 : vector<16x16xf32>
    %122 = arith.truncf %121 : vector<16x16xf32> to vector<16x16xbf16>
    %cst_39 = arith.constant dense<0.000000e+00> : vector<16x8xf32>
    %123 = tpu.matmul %122, %109, %cst_39 {dimension_numbers = #tpu.dot_dimension_numbers<[1], [0], [0], [1], [0, 0, 1, 1], [], []>} : vector<16x16xbf16>, vector<16x8xbf16>, vector<16x8xf32> -> vector<16x8xf32>
    %124 = vector.extract_strided_slice %63 {offsets = [0, 24], sizes = [16, 8], strides = [1, 1]} : vector<16x96xf32> to vector<16x8xf32>
    %125 = arith.truncf %124 : vector<16x8xf32> to vector<16x8xbf16>
    %126 = vector.extract_strided_slice %63 {offsets = [0, 56], sizes = [16, 8], strides = [1, 1]} : vector<16x96xf32> to vector<16x8xf32>
    %127 = arith.truncf %126 : vector<16x8xf32> to vector<16x8xbf16>
    %128 = vector.extract_strided_slice %63 {offsets = [0, 88], sizes = [16, 8], strides = [1, 1]} : vector<16x96xf32> to vector<16x8xf32>
    %129 = arith.truncf %128 : vector<16x8xf32> to vector<16x8xbf16>
    %cst_40 = arith.constant dense<0.000000e+00> : vector<16x16xf32>
    %130 = tpu.matmul %125, %127, %cst_40 {dimension_numbers = #tpu.dot_dimension_numbers<[1], [1], [0], [0], [0, 0, 1, 0], [], []>} : vector<16x8xbf16>, vector<16x8xbf16>, vector<16x16xf32> -> vector<16x16xf32>
    %131 = arith.addf %130, %3 : vector<16x16xf32>
    %cst_41 = arith.constant dense<0xFF800000> : vector<16xf32>
    %132 = vector.multi_reduction <maximumf>, %131, %cst_41 [1] : vector<16x16xf32> to vector<16xf32>
    %133 = vector.shape_cast %132 : vector<16xf32> to vector<16x1xf32>
    %134 = vector.broadcast %133 : vector<16x1xf32> to vector<16x16xf32>
    %135 = arith.subf %131, %134 : vector<16x16xf32>
    %136 = math.exp %135 : vector<16x16xf32>
    %cst_42 = arith.constant dense<0.000000e+00> : vector<16xf32>
    %137 = vector.multi_reduction <add>, %136, %cst_42 [1] : vector<16x16xf32> to vector<16xf32>
    %138 = vector.shape_cast %137 : vector<16xf32> to vector<16x1xf32>
    %139 = tpu.reciprocal %138 {approx = true} : vector<16x1xf32> -> vector<16x1xf32>
    %140 = vector.broadcast %139 : vector<16x1xf32> to vector<16x16xf32>
    %141 = arith.mulf %136, %140 : vector<16x16xf32>
    %142 = arith.truncf %141 : vector<16x16xf32> to vector<16x16xbf16>
    %cst_43 = arith.constant dense<0.000000e+00> : vector<16x8xf32>
    %143 = tpu.matmul %142, %129, %cst_43 {dimension_numbers = #tpu.dot_dimension_numbers<[1], [0], [0], [1], [0, 0, 1, 1], [], []>} : vector<16x16xbf16>, vector<16x8xbf16>, vector<16x8xf32> -> vector<16x8xf32>
    %144 = tpu.concatenate %83, %103, %123, %143 in 1 : vector<16x8xf32>, vector<16x8xf32>, vector<16x8xf32>, vector<16x8xf32> -> vector<16x32xf32>
    %145 = arith.truncf %144 : vector<16x32xf32> to vector<16x32xbf16>
    %cst_44 = arith.constant dense<0.000000e+00> : vector<16x32xf32>
    %146 = tpu.matmul %145, %57, %cst_44 {dimension_numbers = #tpu.dot_dimension_numbers<[1], [0], [0], [1], [0, 0, 1, 1], [], []>} : vector<16x32xbf16>, vector<32x32xbf16>, vector<16x32xf32> -> vector<16x32xf32>
    %147 = vector.broadcast %49 : vector<1x32xf32> to vector<16x32xf32>
    %148 = arith.addf %146, %147 : vector<16x32xf32>
    %149 = arith.addf %47, %148 : vector<16x32xf32>
    %cst_45 = arith.constant dense<0.000000e+00> : vector<16xf32>
    %150 = vector.multi_reduction <add>, %149, %cst_45 [1] : vector<16x32xf32> to vector<16xf32>
    %151 = vector.shape_cast %150 : vector<16xf32> to vector<16x1xf32>
    %cst_46 = arith.constant 3.200000e+01 : f32
    %152 = vector.broadcast %cst_46 : f32 to vector<16x1xf32>
    %153 = arith.divf %151, %152 : vector<16x1xf32>
    %154 = vector.broadcast %153 : vector<16x1xf32> to vector<16x32xf32>
    %155 = arith.subf %149, %154 : vector<16x32xf32>
    %156 = arith.mulf %155, %155 : vector<16x32xf32>
    %cst_47 = arith.constant dense<0.000000e+00> : vector<16xf32>
    %157 = vector.multi_reduction <add>, %156, %cst_47 [1] : vector<16x32xf32> to vector<16xf32>
    %158 = vector.shape_cast %157 : vector<16xf32> to vector<16x1xf32>
    %cst_48 = arith.constant 3.200000e+01 : f32
    %159 = vector.broadcast %cst_48 : f32 to vector<16x1xf32>
    %160 = arith.divf %158, %159 : vector<16x1xf32>
    %161 = vector.broadcast %153 : vector<16x1xf32> to vector<16x32xf32>
    %162 = arith.subf %149, %161 : vector<16x32xf32>
    %cst_49 = arith.constant 9.99999996E-13 : f32
    %163 = vector.broadcast %cst_49 : f32 to vector<16x1xf32>
    %164 = arith.addf %160, %163 : vector<16x1xf32>
    %165 = math.rsqrt %164 : vector<16x1xf32>
    %166 = vector.broadcast %165 : vector<16x1xf32> to vector<16x32xf32>
    %167 = arith.mulf %162, %166 : vector<16x32xf32>
    %168 = vector.broadcast %50 : vector<1x32xf32> to vector<16x32xf32>
    %169 = arith.mulf %167, %168 : vector<16x32xf32>
    %170 = vector.broadcast %51 : vector<1x32xf32> to vector<16x32xf32>
    %171 = arith.addf %169, %170 : vector<16x32xf32>
    %172 = arith.truncf %171 : vector<16x32xf32> to vector<16x32xbf16>
    %cst_50 = arith.constant dense<0.000000e+00> : vector<16x64xf32>
    %173 = tpu.matmul %172, %58, %cst_50 {dimension_numbers = #tpu.dot_dimension_numbers<[1], [0], [0], [1], [0, 0, 1, 1], [], []>} : vector<16x32xbf16>, vector<32x64xbf16>, vector<16x64xf32> -> vector<16x64xf32>
    %174 = vector.broadcast %52 : vector<1x64xf32> to vector<16x64xf32>
    %175 = arith.addf %173, %174 : vector<16x64xf32>
    %cst_51 = arith.constant 0.000000e+00 : f32
    %176 = vector.broadcast %cst_51 : f32 to vector<16x64xf32>
    %177 = arith.maximumf %175, %176 : vector<16x64xf32>
    %178 = arith.truncf %177 : vector<16x64xf32> to vector<16x64xbf16>
    %cst_52 = arith.constant dense<0.000000e+00> : vector<16x32xf32>
    %179 = tpu.matmul %178, %59, %cst_52 {dimension_numbers = #tpu.dot_dimension_numbers<[1], [0], [0], [1], [0, 0, 1, 1], [], []>} : vector<16x64xbf16>, vector<64x32xbf16>, vector<16x32xf32> -> vector<16x32xf32>
    %180 = vector.broadcast %53 : vector<1x32xf32> to vector<16x32xf32>
    %181 = arith.addf %179, %180 : vector<16x32xf32>
    %182 = arith.addf %171, %181 : vector<16x32xf32>
    %cst_53 = arith.constant dense<0.000000e+00> : vector<16xf32>
    %183 = vector.multi_reduction <add>, %182, %cst_53 [1] : vector<16x32xf32> to vector<16xf32>
    %184 = vector.shape_cast %183 : vector<16xf32> to vector<16x1xf32>
    %cst_54 = arith.constant 3.200000e+01 : f32
    %185 = vector.broadcast %cst_54 : f32 to vector<16x1xf32>
    %186 = arith.divf %184, %185 : vector<16x1xf32>
    %187 = vector.broadcast %186 : vector<16x1xf32> to vector<16x32xf32>
    %188 = arith.subf %182, %187 : vector<16x32xf32>
    %189 = arith.mulf %188, %188 : vector<16x32xf32>
    %cst_55 = arith.constant dense<0.000000e+00> : vector<16xf32>
    %190 = vector.multi_reduction <add>, %189, %cst_55 [1] : vector<16x32xf32> to vector<16xf32>
    %191 = vector.shape_cast %190 : vector<16xf32> to vector<16x1xf32>
    %cst_56 = arith.constant 3.200000e+01 : f32
    %192 = vector.broadcast %cst_56 : f32 to vector<16x1xf32>
    %193 = arith.divf %191, %192 : vector<16x1xf32>
    %194 = vector.broadcast %186 : vector<16x1xf32> to vector<16x32xf32>
    %195 = arith.subf %182, %194 : vector<16x32xf32>
    %cst_57 = arith.constant 9.99999996E-13 : f32
    %196 = vector.broadcast %cst_57 : f32 to vector<16x1xf32>
    %197 = arith.addf %193, %196 : vector<16x1xf32>
    %198 = math.rsqrt %197 : vector<16x1xf32>
    %199 = vector.broadcast %198 : vector<16x1xf32> to vector<16x32xf32>
    %200 = arith.mulf %195, %199 : vector<16x32xf32>
    %201 = vector.broadcast %54 : vector<1x32xf32> to vector<16x32xf32>
    %202 = arith.mulf %200, %201 : vector<16x32xf32>
    %203 = vector.broadcast %55 : vector<1x32xf32> to vector<16x32xf32>
    %204 = arith.addf %202, %203 : vector<16x32xf32>
    %c104 = arith.constant 104 : index
    %c0_58 = arith.constant 0 : index
    %205 = vector.load %arg1[%c104, %c0_58] : memref<120x128xf32, #tpu.memory_space<vmem>>, vector<1x96xf32>
    %c105 = arith.constant 105 : index
    %c0_59 = arith.constant 0 : index
    %206 = vector.load %arg1[%c105, %c0_59] : memref<120x128xf32, #tpu.memory_space<vmem>>, vector<1x32xf32>
    %c106 = arith.constant 106 : index
    %c0_60 = arith.constant 0 : index
    %207 = vector.load %arg1[%c106, %c0_60] : memref<120x128xf32, #tpu.memory_space<vmem>>, vector<1x32xf32>
    %c107 = arith.constant 107 : index
    %c0_61 = arith.constant 0 : index
    %208 = vector.load %arg1[%c107, %c0_61] : memref<120x128xf32, #tpu.memory_space<vmem>>, vector<1x32xf32>
    %c108 = arith.constant 108 : index
    %c0_62 = arith.constant 0 : index
    %209 = vector.load %arg1[%c108, %c0_62] : memref<120x128xf32, #tpu.memory_space<vmem>>, vector<1x64xf32>
    %c109 = arith.constant 109 : index
    %c0_63 = arith.constant 0 : index
    %210 = vector.load %arg1[%c109, %c0_63] : memref<120x128xf32, #tpu.memory_space<vmem>>, vector<1x32xf32>
    %c110 = arith.constant 110 : index
    %c0_64 = arith.constant 0 : index
    %211 = vector.load %arg1[%c110, %c0_64] : memref<120x128xf32, #tpu.memory_space<vmem>>, vector<1x32xf32>
    %c111 = arith.constant 111 : index
    %c0_65 = arith.constant 0 : index
    %212 = vector.load %arg1[%c111, %c0_65] : memref<120x128xf32, #tpu.memory_space<vmem>>, vector<1x32xf32>
    %c160 = arith.constant 160 : index
    %c0_66 = arith.constant 0 : index
    %213 = vector.load %arg2[%c160, %c0_66] : memref<384x128xbf16, #tpu.memory_space<vmem>>, vector<32x96xbf16>
    %c192 = arith.constant 192 : index
    %c0_67 = arith.constant 0 : index
    %214 = vector.load %arg2[%c192, %c0_67] : memref<384x128xbf16, #tpu.memory_space<vmem>>, vector<32x32xbf16>
    %c224 = arith.constant 224 : index
    %c0_68 = arith.constant 0 : index
    %215 = vector.load %arg2[%c224, %c0_68] : memref<384x128xbf16, #tpu.memory_space<vmem>>, vector<32x64xbf16>
    %c256 = arith.constant 256 : index
    %c0_69 = arith.constant 0 : index
    %216 = vector.load %arg2[%c256, %c0_69] : memref<384x128xbf16, #tpu.memory_space<vmem>>, vector<64x32xbf16>
    %217 = arith.truncf %204 : vector<16x32xf32> to vector<16x32xbf16>
    %cst_70 = arith.constant dense<0.000000e+00> : vector<16x96xf32>
    %218 = tpu.matmul %217, %213, %cst_70 {dimension_numbers = #tpu.dot_dimension_numbers<[1], [0], [0], [1], [0, 0, 1, 1], [], []>} : vector<16x32xbf16>, vector<32x96xbf16>, vector<16x96xf32> -> vector<16x96xf32>
    %219 = vector.broadcast %205 : vector<1x96xf32> to vector<16x96xf32>
    %220 = arith.addf %218, %219 : vector<16x96xf32>
    %221 = vector.extract_strided_slice %220 {offsets = [0, 0], sizes = [16, 8], strides = [1, 1]} : vector<16x96xf32> to vector<16x8xf32>
    %222 = arith.truncf %221 : vector<16x8xf32> to vector<16x8xbf16>
    %223 = vector.extract_strided_slice %220 {offsets = [0, 32], sizes = [16, 8], strides = [1, 1]} : vector<16x96xf32> to vector<16x8xf32>
    %224 = arith.truncf %223 : vector<16x8xf32> to vector<16x8xbf16>
    %225 = vector.extract_strided_slice %220 {offsets = [0, 64], sizes = [16, 8], strides = [1, 1]} : vector<16x96xf32> to vector<16x8xf32>
    %226 = arith.truncf %225 : vector<16x8xf32> to vector<16x8xbf16>
    %cst_71 = arith.constant dense<0.000000e+00> : vector<16x16xf32>
    %227 = tpu.matmul %222, %224, %cst_71 {dimension_numbers = #tpu.dot_dimension_numbers<[1], [1], [0], [0], [0, 0, 1, 0], [], []>} : vector<16x8xbf16>, vector<16x8xbf16>, vector<16x16xf32> -> vector<16x16xf32>
    %228 = arith.addf %227, %3 : vector<16x16xf32>
    %cst_72 = arith.constant dense<0xFF800000> : vector<16xf32>
    %229 = vector.multi_reduction <maximumf>, %228, %cst_72 [1] : vector<16x16xf32> to vector<16xf32>
    %230 = vector.shape_cast %229 : vector<16xf32> to vector<16x1xf32>
    %231 = vector.broadcast %230 : vector<16x1xf32> to vector<16x16xf32>
    %232 = arith.subf %228, %231 : vector<16x16xf32>
    %233 = math.exp %232 : vector<16x16xf32>
    %cst_73 = arith.constant dense<0.000000e+00> : vector<16xf32>
    %234 = vector.multi_reduction <add>, %233, %cst_73 [1] : vector<16x16xf32> to vector<16xf32>
    %235 = vector.shape_cast %234 : vector<16xf32> to vector<16x1xf32>
    %236 = tpu.reciprocal %235 {approx = true} : vector<16x1xf32> -> vector<16x1xf32>
    %237 = vector.broadcast %236 : vector<16x1xf32> to vector<16x16xf32>
    %238 = arith.mulf %233, %237 : vector<16x16xf32>
    %239 = arith.truncf %238 : vector<16x16xf32> to vector<16x16xbf16>
    %cst_74 = arith.constant dense<0.000000e+00> : vector<16x8xf32>
    %240 = tpu.matmul %239, %226, %cst_74 {dimension_numbers = #tpu.dot_dimension_numbers<[1], [0], [0], [1], [0, 0, 1, 1], [], []>} : vector<16x16xbf16>, vector<16x8xbf16>, vector<16x8xf32> -> vector<16x8xf32>
    %241 = vector.extract_strided_slice %220 {offsets = [0, 8], sizes = [16, 8], strides = [1, 1]} : vector<16x96xf32> to vector<16x8xf32>
    %242 = arith.truncf %241 : vector<16x8xf32> to vector<16x8xbf16>
    %243 = vector.extract_strided_slice %220 {offsets = [0, 40], sizes = [16, 8], strides = [1, 1]} : vector<16x96xf32> to vector<16x8xf32>
    %244 = arith.truncf %243 : vector<16x8xf32> to vector<16x8xbf16>
    %245 = vector.extract_strided_slice %220 {offsets = [0, 72], sizes = [16, 8], strides = [1, 1]} : vector<16x96xf32> to vector<16x8xf32>
    %246 = arith.truncf %245 : vector<16x8xf32> to vector<16x8xbf16>
    %cst_75 = arith.constant dense<0.000000e+00> : vector<16x16xf32>
    %247 = tpu.matmul %242, %244, %cst_75 {dimension_numbers = #tpu.dot_dimension_numbers<[1], [1], [0], [0], [0, 0, 1, 0], [], []>} : vector<16x8xbf16>, vector<16x8xbf16>, vector<16x16xf32> -> vector<16x16xf32>
    %248 = arith.addf %247, %3 : vector<16x16xf32>
    %cst_76 = arith.constant dense<0xFF800000> : vector<16xf32>
    %249 = vector.multi_reduction <maximumf>, %248, %cst_76 [1] : vector<16x16xf32> to vector<16xf32>
    %250 = vector.shape_cast %249 : vector<16xf32> to vector<16x1xf32>
    %251 = vector.broadcast %250 : vector<16x1xf32> to vector<16x16xf32>
    %252 = arith.subf %248, %251 : vector<16x16xf32>
    %253 = math.exp %252 : vector<16x16xf32>
    %cst_77 = arith.constant dense<0.000000e+00> : vector<16xf32>
    %254 = vector.multi_reduction <add>, %253, %cst_77 [1] : vector<16x16xf32> to vector<16xf32>
    %255 = vector.shape_cast %254 : vector<16xf32> to vector<16x1xf32>
    %256 = tpu.reciprocal %255 {approx = true} : vector<16x1xf32> -> vector<16x1xf32>
    %257 = vector.broadcast %256 : vector<16x1xf32> to vector<16x16xf32>
    %258 = arith.mulf %253, %257 : vector<16x16xf32>
    %259 = arith.truncf %258 : vector<16x16xf32> to vector<16x16xbf16>
    %cst_78 = arith.constant dense<0.000000e+00> : vector<16x8xf32>
    %260 = tpu.matmul %259, %246, %cst_78 {dimension_numbers = #tpu.dot_dimension_numbers<[1], [0], [0], [1], [0, 0, 1, 1], [], []>} : vector<16x16xbf16>, vector<16x8xbf16>, vector<16x8xf32> -> vector<16x8xf32>
    %261 = vector.extract_strided_slice %220 {offsets = [0, 16], sizes = [16, 8], strides = [1, 1]} : vector<16x96xf32> to vector<16x8xf32>
    %262 = arith.truncf %261 : vector<16x8xf32> to vector<16x8xbf16>
    %263 = vector.extract_strided_slice %220 {offsets = [0, 48], sizes = [16, 8], strides = [1, 1]} : vector<16x96xf32> to vector<16x8xf32>
    %264 = arith.truncf %263 : vector<16x8xf32> to vector<16x8xbf16>
    %265 = vector.extract_strided_slice %220 {offsets = [0, 80], sizes = [16, 8], strides = [1, 1]} : vector<16x96xf32> to vector<16x8xf32>
    %266 = arith.truncf %265 : vector<16x8xf32> to vector<16x8xbf16>
    %cst_79 = arith.constant dense<0.000000e+00> : vector<16x16xf32>
    %267 = tpu.matmul %262, %264, %cst_79 {dimension_numbers = #tpu.dot_dimension_numbers<[1], [1], [0], [0], [0, 0, 1, 0], [], []>} : vector<16x8xbf16>, vector<16x8xbf16>, vector<16x16xf32> -> vector<16x16xf32>
    %268 = arith.addf %267, %3 : vector<16x16xf32>
    %cst_80 = arith.constant dense<0xFF800000> : vector<16xf32>
    %269 = vector.multi_reduction <maximumf>, %268, %cst_80 [1] : vector<16x16xf32> to vector<16xf32>
    %270 = vector.shape_cast %269 : vector<16xf32> to vector<16x1xf32>
    %271 = vector.broadcast %270 : vector<16x1xf32> to vector<16x16xf32>
    %272 = arith.subf %268, %271 : vector<16x16xf32>
    %273 = math.exp %272 : vector<16x16xf32>
    %cst_81 = arith.constant dense<0.000000e+00> : vector<16xf32>
    %274 = vector.multi_reduction <add>, %273, %cst_81 [1] : vector<16x16xf32> to vector<16xf32>
    %275 = vector.shape_cast %274 : vector<16xf32> to vector<16x1xf32>
    %276 = tpu.reciprocal %275 {approx = true} : vector<16x1xf32> -> vector<16x1xf32>
    %277 = vector.broadcast %276 : vector<16x1xf32> to vector<16x16xf32>
    %278 = arith.mulf %273, %277 : vector<16x16xf32>
    %279 = arith.truncf %278 : vector<16x16xf32> to vector<16x16xbf16>
    %cst_82 = arith.constant dense<0.000000e+00> : vector<16x8xf32>
    %280 = tpu.matmul %279, %266, %cst_82 {dimension_numbers = #tpu.dot_dimension_numbers<[1], [0], [0], [1], [0, 0, 1, 1], [], []>} : vector<16x16xbf16>, vector<16x8xbf16>, vector<16x8xf32> -> vector<16x8xf32>
    %281 = vector.extract_strided_slice %220 {offsets = [0, 24], sizes = [16, 8], strides = [1, 1]} : vector<16x96xf32> to vector<16x8xf32>
    %282 = arith.truncf %281 : vector<16x8xf32> to vector<16x8xbf16>
    %283 = vector.extract_strided_slice %220 {offsets = [0, 56], sizes = [16, 8], strides = [1, 1]} : vector<16x96xf32> to vector<16x8xf32>
    %284 = arith.truncf %283 : vector<16x8xf32> to vector<16x8xbf16>
    %285 = vector.extract_strided_slice %220 {offsets = [0, 88], sizes = [16, 8], strides = [1, 1]} : vector<16x96xf32> to vector<16x8xf32>
    %286 = arith.truncf %285 : vector<16x8xf32> to vector<16x8xbf16>
    %cst_83 = arith.constant dense<0.000000e+00> : vector<16x16xf32>
    %287 = tpu.matmul %282, %284, %cst_83 {dimension_numbers = #tpu.dot_dimension_numbers<[1], [1], [0], [0], [0, 0, 1, 0], [], []>} : vector<16x8xbf16>, vector<16x8xbf16>, vector<16x16xf32> -> vector<16x16xf32>
    %288 = arith.addf %287, %3 : vector<16x16xf32>
    %cst_84 = arith.constant dense<0xFF800000> : vector<16xf32>
    %289 = vector.multi_reduction <maximumf>, %288, %cst_84 [1] : vector<16x16xf32> to vector<16xf32>
    %290 = vector.shape_cast %289 : vector<16xf32> to vector<16x1xf32>
    %291 = vector.broadcast %290 : vector<16x1xf32> to vector<16x16xf32>
    %292 = arith.subf %288, %291 : vector<16x16xf32>
    %293 = math.exp %292 : vector<16x16xf32>
    %cst_85 = arith.constant dense<0.000000e+00> : vector<16xf32>
    %294 = vector.multi_reduction <add>, %293, %cst_85 [1] : vector<16x16xf32> to vector<16xf32>
    %295 = vector.shape_cast %294 : vector<16xf32> to vector<16x1xf32>
    %296 = tpu.reciprocal %295 {approx = true} : vector<16x1xf32> -> vector<16x1xf32>
    %297 = vector.broadcast %296 : vector<16x1xf32> to vector<16x16xf32>
    %298 = arith.mulf %293, %297 : vector<16x16xf32>
    %299 = arith.truncf %298 : vector<16x16xf32> to vector<16x16xbf16>
    %cst_86 = arith.constant dense<0.000000e+00> : vector<16x8xf32>
    %300 = tpu.matmul %299, %286, %cst_86 {dimension_numbers = #tpu.dot_dimension_numbers<[1], [0], [0], [1], [0, 0, 1, 1], [], []>} : vector<16x16xbf16>, vector<16x8xbf16>, vector<16x8xf32> -> vector<16x8xf32>
    %301 = tpu.concatenate %240, %260, %280, %300 in 1 : vector<16x8xf32>, vector<16x8xf32>, vector<16x8xf32>, vector<16x8xf32> -> vector<16x32xf32>
    %302 = arith.truncf %301 : vector<16x32xf32> to vector<16x32xbf16>
    %cst_87 = arith.constant dense<0.000000e+00> : vector<16x32xf32>
    %303 = tpu.matmul %302, %214, %cst_87 {dimension_numbers = #tpu.dot_dimension_numbers<[1], [0], [0], [1], [0, 0, 1, 1], [], []>} : vector<16x32xbf16>, vector<32x32xbf16>, vector<16x32xf32> -> vector<16x32xf32>
    %304 = vector.broadcast %206 : vector<1x32xf32> to vector<16x32xf32>
    %305 = arith.addf %303, %304 : vector<16x32xf32>
    %306 = arith.addf %204, %305 : vector<16x32xf32>
    %cst_88 = arith.constant dense<0.000000e+00> : vector<16xf32>
    %307 = vector.multi_reduction <add>, %306, %cst_88 [1] : vector<16x32xf32> to vector<16xf32>
    %308 = vector.shape_cast %307 : vector<16xf32> to vector<16x1xf32>
    %cst_89 = arith.constant 3.200000e+01 : f32
    %309 = vector.broadcast %cst_89 : f32 to vector<16x1xf32>
    %310 = arith.divf %308, %309 : vector<16x1xf32>
    %311 = vector.broadcast %310 : vector<16x1xf32> to vector<16x32xf32>
    %312 = arith.subf %306, %311 : vector<16x32xf32>
    %313 = arith.mulf %312, %312 : vector<16x32xf32>
    %cst_90 = arith.constant dense<0.000000e+00> : vector<16xf32>
    %314 = vector.multi_reduction <add>, %313, %cst_90 [1] : vector<16x32xf32> to vector<16xf32>
    %315 = vector.shape_cast %314 : vector<16xf32> to vector<16x1xf32>
    %cst_91 = arith.constant 3.200000e+01 : f32
    %316 = vector.broadcast %cst_91 : f32 to vector<16x1xf32>
    %317 = arith.divf %315, %316 : vector<16x1xf32>
    %318 = vector.broadcast %310 : vector<16x1xf32> to vector<16x32xf32>
    %319 = arith.subf %306, %318 : vector<16x32xf32>
    %cst_92 = arith.constant 9.99999996E-13 : f32
    %320 = vector.broadcast %cst_92 : f32 to vector<16x1xf32>
    %321 = arith.addf %317, %320 : vector<16x1xf32>
    %322 = math.rsqrt %321 : vector<16x1xf32>
    %323 = vector.broadcast %322 : vector<16x1xf32> to vector<16x32xf32>
    %324 = arith.mulf %319, %323 : vector<16x32xf32>
    %325 = vector.broadcast %207 : vector<1x32xf32> to vector<16x32xf32>
    %326 = arith.mulf %324, %325 : vector<16x32xf32>
    %327 = vector.broadcast %208 : vector<1x32xf32> to vector<16x32xf32>
    %328 = arith.addf %326, %327 : vector<16x32xf32>
    %329 = arith.truncf %328 : vector<16x32xf32> to vector<16x32xbf16>
    %cst_93 = arith.constant dense<0.000000e+00> : vector<16x64xf32>
    %330 = tpu.matmul %329, %215, %cst_93 {dimension_numbers = #tpu.dot_dimension_numbers<[1], [0], [0], [1], [0, 0, 1, 1], [], []>} : vector<16x32xbf16>, vector<32x64xbf16>, vector<16x64xf32> -> vector<16x64xf32>
    %331 = vector.broadcast %209 : vector<1x64xf32> to vector<16x64xf32>
    %332 = arith.addf %330, %331 : vector<16x64xf32>
    %cst_94 = arith.constant 0.000000e+00 : f32
    %333 = vector.broadcast %cst_94 : f32 to vector<16x64xf32>
    %334 = arith.maximumf %332, %333 : vector<16x64xf32>
    %335 = arith.truncf %334 : vector<16x64xf32> to vector<16x64xbf16>
    %cst_95 = arith.constant dense<0.000000e+00> : vector<16x32xf32>
    %336 = tpu.matmul %335, %216, %cst_95 {dimension_numbers = #tpu.dot_dimension_numbers<[1], [0], [0], [1], [0, 0, 1, 1], [], []>} : vector<16x64xbf16>, vector<64x32xbf16>, vector<16x32xf32> -> vector<16x32xf32>
    %337 = vector.broadcast %210 : vector<1x32xf32> to vector<16x32xf32>
    %338 = arith.addf %336, %337 : vector<16x32xf32>
    %339 = arith.addf %328, %338 : vector<16x32xf32>
    %cst_96 = arith.constant dense<0.000000e+00> : vector<16xf32>
    %340 = vector.multi_reduction <add>, %339, %cst_96 [1] : vector<16x32xf32> to vector<16xf32>
    %341 = vector.shape_cast %340 : vector<16xf32> to vector<16x1xf32>
    %cst_97 = arith.constant 3.200000e+01 : f32
    %342 = vector.broadcast %cst_97 : f32 to vector<16x1xf32>
    %343 = arith.divf %341, %342 : vector<16x1xf32>
    %344 = vector.broadcast %343 : vector<16x1xf32> to vector<16x32xf32>
    %345 = arith.subf %339, %344 : vector<16x32xf32>
    %346 = arith.mulf %345, %345 : vector<16x32xf32>
    %cst_98 = arith.constant dense<0.000000e+00> : vector<16xf32>
    %347 = vector.multi_reduction <add>, %346, %cst_98 [1] : vector<16x32xf32> to vector<16xf32>
    %348 = vector.shape_cast %347 : vector<16xf32> to vector<16x1xf32>
    %cst_99 = arith.constant 3.200000e+01 : f32
    %349 = vector.broadcast %cst_99 : f32 to vector<16x1xf32>
    %350 = arith.divf %348, %349 : vector<16x1xf32>
    %351 = vector.broadcast %343 : vector<16x1xf32> to vector<16x32xf32>
    %352 = arith.subf %339, %351 : vector<16x32xf32>
    %cst_100 = arith.constant 9.99999996E-13 : f32
    %353 = vector.broadcast %cst_100 : f32 to vector<16x1xf32>
    %354 = arith.addf %350, %353 : vector<16x1xf32>
    %355 = math.rsqrt %354 : vector<16x1xf32>
    %356 = vector.broadcast %355 : vector<16x1xf32> to vector<16x32xf32>
    %357 = arith.mulf %352, %356 : vector<16x32xf32>
    %358 = vector.broadcast %211 : vector<1x32xf32> to vector<16x32xf32>
    %359 = arith.mulf %357, %358 : vector<16x32xf32>
    %360 = vector.broadcast %212 : vector<1x32xf32> to vector<16x32xf32>
    %361 = arith.addf %359, %360 : vector<16x32xf32>
    %c320 = arith.constant 320 : index
    %c0_101 = arith.constant 0 : index
    %362 = vector.load %arg2[%c320, %c0_101] : memref<384x128xbf16, #tpu.memory_space<vmem>>, vector<32x32xbf16>
    %c352 = arith.constant 352 : index
    %c0_102 = arith.constant 0 : index
    %363 = vector.load %arg2[%c352, %c0_102] : memref<384x128xbf16, #tpu.memory_space<vmem>>, vector<32x2xbf16>
    %c112 = arith.constant 112 : index
    %c0_103 = arith.constant 0 : index
    %364 = vector.load %arg1[%c112, %c0_103] : memref<120x128xf32, #tpu.memory_space<vmem>>, vector<1x32xf32>
    %c113 = arith.constant 113 : index
    %c0_104 = arith.constant 0 : index
    %365 = vector.load %arg1[%c113, %c0_104] : memref<120x128xf32, #tpu.memory_space<vmem>>, vector<1x2xf32>
    %366 = arith.truncf %361 : vector<16x32xf32> to vector<16x32xbf16>
    %cst_105 = arith.constant dense<0.000000e+00> : vector<16x32xf32>
    %367 = tpu.matmul %366, %362, %cst_105 {dimension_numbers = #tpu.dot_dimension_numbers<[1], [0], [0], [1], [0, 0, 1, 1], [], []>} : vector<16x32xbf16>, vector<32x32xbf16>, vector<16x32xf32> -> vector<16x32xf32>
    %368 = vector.broadcast %364 : vector<1x32xf32> to vector<16x32xf32>
    %369 = arith.addf %367, %368 : vector<16x32xf32>
    %370 = math.tanh %369 : vector<16x32xf32>
    %371 = arith.truncf %370 : vector<16x32xf32> to vector<16x32xbf16>
    %cst_106 = arith.constant dense<0.000000e+00> : vector<16x2xf32>
    %372 = tpu.matmul %371, %363, %cst_106 {dimension_numbers = #tpu.dot_dimension_numbers<[1], [0], [0], [1], [0, 0, 1, 1], [], []>} : vector<16x32xbf16>, vector<32x2xbf16>, vector<16x2xf32> -> vector<16x2xf32>
    %373 = vector.broadcast %365 : vector<1x2xf32> to vector<16x2xf32>
    %374 = arith.addf %372, %373 : vector<16x2xf32>
    %c0_107 = arith.constant 0 : index
    %c0_108 = arith.constant 0 : index
    %375 = vector.load %arg3[%c0_107, %c0_108] : memref<16x2xf32, #tpu.memory_space<vmem>>, vector<16x2xf32>
    tpu.vector_store %arg3[%c0_107, %c0_108], %374 {strides = array<i32>} : memref<16x2xf32, #tpu.memory_space<vmem>>, vector<16x2xf32>,
    return
  }
}

</mosaic_0001>

<bundles_post_ra>
// kernel: transformer_forward.1
= control target key start
LH: loop header
LB: loop body
LE: loop exit
PB: predicated region body
PF: predicated region fallthrough
CT: control target
= control target key end

     0   :  { %8 = vsyncpa [#allocation3], 0  ;;  %s2683_s12 = smov [#allocation2]   ;;  %s3134_s0 = inlined_call_operand.vmem [shape: f32[16,128], index: 0, kind: input, shape index: {}]   ;;  %s3135_s1 = inlined_call_operand.hbm [shape: f32[120,128], index: 1, kind: input, shape index: {}]   ;;  %s3136_s2 = inlined_call_operand.vmem [shape: bf16[384,128], index: 2, kind: input, shape index: {}]   ;;  %s3137_s3 = inlined_call_operand.vmem [shape: f32[16,2], index: 3, kind: output, shape index: {}]  }
   0x1   :  { %s16_s13 = sshll.u32 %s2683_s12, 4  ;;  %s2659_s16 = scalar_lea.hbm %s3135_s1, 1920  ;;  %s17_s13 = int_to_ptr.vmem [resolvable:$true] %s16_s13 }
   0x2   :  { %p2660_p0 = scmp.ne.s32.totalorder %s3135_s1, %s2659_s16  ;;  %p2663_p1 = scmp.lt.u32.totalorder %s2659_s16, %s3135_s1 }
   0x4   :  { %p2665_p2 = pnand %p2663_p1, %p2660_p0 }
   0x6   :  { %2668 = shalt.err (!%p2665_p2)
}
   0x7   :  { %s2669_s21 = scalar_lea.vmem %s17_s13, 1920  ;;  %p2674_p4 = scmp.lt.s32.totalorder %s17_s13, %s17_s13 }
   0x8   :  { %p2670_p3 = scmp.ne.s32.totalorder %s17_s13, %s2669_s21  ;;  %p2675_p5 = scmp.lt.s32.totalorder %s2669_s21, %s2669_s21 }
   0xa   :  { %p2676_p6 = por %p2675_p5, %p2674_p4 }
   0xc   :  { %p2677_p7 = pnand %p2676_p6, %p2670_p3 }
   0xe   :  { %2680 = shalt.err (!%p2677_p7)
}
   0xf   :  { %s2684_s22 = smov 128   ;;  %s2685_s23 = smov 8  }
  0x10   :  { %22 = dma.hbm_to_vmem [thread:$0]  %s3135_s1, 1920, %s17_s13, [#allocation3], %s2684_s22, %s2684_s22, %s2685_s23  }
  0x11   :  { %2681 = dma.done.wait [#allocation3], 1920  }
  0x12   :  { %2682 = vsyncadd [#allocation3], 4294965376  ;;  %v2686_v0 = vmov 0   ;;  %v2739_v1 = vld [vmem:[%s3134_s0] sm:$0xff]  ;;  %v2744_v2 = vld [vmem:[%s3134_s0 + $0x8] sm:$0xff]  ;;  %v2687_v18 = vmov 0.0   ;;  %v44_v21 = vlaneseq }
  0x13   :  { %2514 = vset.pattern.permute.xlu0 %v2686_v0  ;;  %v31_v3 = vld [vmem:[#allocation2] sm:$0xff]  ;;  %v2490_v4 = vtrunc.f32 %v2739_v1  ;;  %v2492_v5 = vtrunc.f32 %v2744_v2  ;;  %v32_v6 = vld [vmem:[#allocation2 + $0x8] sm:$0xff]  ;;  %v33_v7 = vld [vmem:[#allocation2 + $0x10] sm:$0xff]  ;;  %2290 = vmatprep.subr.bf16.mxu1 %v2687_v18  ;;  %v2688_v20 = vmov 1   ;;  %vm86_vm0 = vcmask 523264   ;;  %s2690_s5 = smov 88  }
  0x14   :  { %v34_v8 = vld [vmem:[#allocation2 + $0x18] sm:$0xff]  ;;  %v2474_v9 = vpack.c.bf16 %v32_v6, %v31_v3  ;;  %v35_v11 = vld [vmem:[#allocation2 + $0x20] sm:$0xff]  ;;  %v36_v12 = vld [vmem:[#allocation2 + $0x28] sm:$0xff]  ;;  %2515 = vset.pattern.permute.xlu1 %v2688_v20  ;;  %v45_v22 = vand.u32 127, %v44_v21  ;;  %v75_v29 = vshrl.u32 %v44_v21, 7  ;;  %vm170_vm3 = vcmask 261120  }
  0x15   :  { %v2478_v10 = vpack.c.bf16 %v34_v8, %v33_v7  ;;  %v2491_v13 = vcvt.f32.s32 %v2490_v4  ;;  %v2493_v14 = vcvt.f32.s32 %v2492_v5  ;;  %v37_v15 = vld [vmem:[#allocation2 + $0x30] sm:$0xff]  ;;  %v2482_v16 = vpack.c.bf16 %v36_v12, %v35_v11  ;;  %v38_v17 = vld [vmem:[#allocation2 + $0x38] sm:$0xff]  ;;  %66 = vperm.xlu1 %2515, %v2739_v1   ;;  %v39_v27 = vld [vmem:[#allocation2 + $0x40] sm:$0x3]  ;;  %s2691_s6 = smov 96   ;;  %s2692_s7 = smov 112  }
  0x16   :  { %2475 = vmatprep.subr.bf16.mxu0 %v2474_v9  ;;  %v2486_v19 = vpack.c.bf16 %v38_v17, %v37_v15  ;;  %v61_v28 = vrot.slane %v39_v27, 7  ;;  %v76_v32 = vsub.s32 1, %v75_v29  ;;  %v82_v34 = vsub.s32 0, %v75_v29  ;;  %v41_v39 = vld [vmem:[#allocation2 + $0x50] sm:$0xff]  ;;  %v40_v41 = vld [vmem:[#allocation2 + $0x48] sm:$0xff]  ;;  %v2547_v61 = vld [vmem:[%s3136_s2] sm:$0xff]  }
  0x17   :  { %49 = vperm.xlu0 %2514, %v2491_v13   ;;  %2477 = vmatpush3.bf16.msra.mxu0 %v2474_v9  ;;  %v2548_v62 = vld [vmem:[%s3136_s2 + $0x8] sm:$0xff]   ;;  %vm2689_vm4 = vmmov 0   ;;  %v2125_v9 = vld [vmem:[#allocation2 + $0x58] ss:$0 sm:$0xff]  ;;  %v2126_v13 = vld [vmem:[#allocation2 + $0x59] ss:$0 sm:$0xff] }
  0x18   :  { %2479 = vmatprep.subr.bf16.mxu0 %v2478_v10  ;;  %v63_v31 = vsub.f32 %v39_v27, %v61_v28  ;;  %v83_v36 = vrot.slane %v39_v27, %v82_v34  ;;  %2291 = vmatpush3.bf16.msra.mxu1 %v2547_v61  ;;  %s2693_s8 = smov 120   ;;  %s2694_s9 = smov 104   ;;  %vm309_vm5 = vcmask 64512   ;;  %vm357_vm6 = vcmask 130048  }
  0x19   :  { %71 = vperm.xlu1 %2515, %v2744_v2   ;;  %2294 = vmatprep.mubr.msk.bf16.mxu1 %vm2689_vm4, %v2687_v18  ;;  %s2695_s10 = smov 80   ;;  %s2696_s11 = smov 72   ;;  %vm819_vm7 = vcmask 195584   ;;  %vm2113_vm8 = vcmask 15360  }
  0x1a   :  { %v77_v33 = vrot.slane %v63_v31, %v76_v32  ;;  %2292 = vmatprep.subr.bf16.mxu1 %v2687_v18  ;;  %s2697_s12 = smov 56   ;;  %s2698_s13 = smov 64  }
  0x1b   :  { %52 = vperm.xlu0 %2514, %v2493_v14   ;;  %2481 = vmatpush3.bf16.msra.mxu0 %v2478_v10  ;;  %s2699_s14 = smov 48   ;;  %s2700_s15 = smov 40  }
  0x1c   :  { %2483 = vmatprep.subr.bf16.mxu0 %v2482_v16  ;;  %2293 = vmatpush3.bf16.msra.mxu1 %v2548_v62  ;;  %s2701_s20 = smov 16   ;;  %s2702_s21 = smov 24  }
  0x1d   :  { %2298 = vmatprep.subr.bf16.mxu1 %v2687_v18 }
  0x1f   :  { %2485 = vmatpush3.bf16.msra.mxu0 %v2482_v16  ;;  %2546 = vset.pattern.permute.xlu0 %v2688_v20 }
  0x20   :  { %2487 = vmatprep.subr.bf16.mxu0 %v2486_v19 }
  0x23   :  { %2489 = vmatpush3.bf16.msra.mxu0 %v2486_v19  ;;  %v2127_v19 = vld [vmem:[#allocation2 + $0x60] ss:$0 sm:$0xff] }
  0x24   :  { %2304 = vmatprep.subr.bf16.mxu0 %v2687_v18 }
  0x94   :  { %v67_v30 = vpop.permute.xlu1 %66 }
  0x95   :  { %v78_v38 = vmul.f32 %v77_v33, %v67_v30 }
  0x96   :  { %v50_v23 = vpop.permute.xlu0 %49 }
  0x97   :  { %vm54_vm1 = vcmp.eq.s32.totalorder %v45_v22, %v50_v23  ;;  %v84_v42 = vadd.f32 %v83_v36, %v78_v38 }
  0x98   :  { %v2121_v24 = vsel %vm54_vm1, 1.0, %v2687_v18  ;;  %v72_v35 = vpop.permute.xlu1 %71 }
  0x99   :  { %2287 = vmatprep.mubr.msk.f32.mxu0 %vm86_vm0, %v2121_v24  ;;  %v79_v37 = vmul.f32 %v77_v33, %v72_v35 }
  0x9a   :  { %v53_v25 = vpop.permute.xlu0 %52 }
  0x9b   :  { %vm55_vm2 = vcmp.eq.s32.totalorder %v45_v22, %v53_v25  ;;  %v85_v40 = vadd.f32 %v83_v36, %v79_v37 }
  0x9c   :  { %v2122_v26 = vsel %vm55_vm2, 1.0, %v2687_v18 }
  0x9d   :  { %2288 = vmatmul.mubr.msk.f32.vlgmr.msra.gmra.mrb[0].mxu0 %vm86_vm0, %v2122_v26 }
  0x9e   :  { %2306 = vmatprep.mubr.msk.bf16.mxu0 %vm2689_vm4, %v2687_v18 }
 0x170   :  { %v2289_v43 = vpop.f32.mrb[0].mxu0 }
 0x171   :  { %v165_v44 = vadd.f32 %v2289_v43, %v41_v39  ;;  %v159_v45 = vpop.f32.mrb[1].mxu0 }
 0x172   :  { %v160_v46 = vadd.f32 %v159_v45, %v40_v41 }
 0x173   :  { %v169_v47 = vadd.f32 %v165_v44, %v85_v40 }
 0x174   :  { %v168_v48 = vadd.f32 %v160_v46, %v84_v42 }
 0x175   :  { %v174_v49 = vsel %vm170_vm3, %v169_v47, 0.0 }
 0x176   :  { %175 = vadd.xlane.f32.xlu1 %v174_v49  ;;  %v171_v50 = vsel %vm170_vm3, %v168_v48, 0.0 }
 0x177   :  { %172 = vadd.xlane.f32.xlu0 %v171_v50 }
 0x203   :  { %v176_v51 = vpop.xlane.xlu1 %175 }
 0x204   :  { %v179_v52 = vmul.f32 0.03125, %v176_v51  ;;  %v173_v53 = vpop.xlane.xlu0 %172 }
 0x205   :  { %v178_v54 = vmul.f32 0.03125, %v173_v53 }
 0x206   :  { %v181_v55 = vsub.f32 %v169_v47, %v179_v52 }
 0x207   :  { %v180_v56 = vsub.f32 %v168_v48, %v178_v54 }
 0x208   :  { %v183_v59 = vmul.f32 %v181_v55, %v181_v55 }
 0x209   :  { %v182_v57 = vmul.f32 %v180_v56, %v180_v56 }
 0x20a   :  { %v187_v60 = vsel %vm170_vm3, %v183_v59, 0.0 }
 0x20b   :  { %v184_v58 = vsel %vm170_vm3, %v182_v57, 0.0 }
 0x20c   :  { %185 = vadd.xlane.f32.xlu0 %v184_v58 }
 0x210   :  { %188 = vadd.xlane.f32.xlu0 %v187_v60 }
 0x299   :  { %v186_v63 = vpop.xlane.xlu0 %185 }
 0x29a   :  { %v190_v0 = vmul.f32 0.03125, %v186_v63 }
 0x29c   :  { %v192_v3 = vadd.f32 1e-12, %v190_v0 }
 0x29d   :  { %v189_v4 = vpop.xlane.xlu0 %188 }
 0x29e   :  { %2571 = vrsqrt.f32 %v192_v3  ;;  %v191_v5 = vmul.f32 0.03125, %v189_v4 }
 0x2a0   :  { %v193_v6 = vadd.f32 1e-12, %v191_v5 }
 0x2a2   :  { %2573 = vrsqrt.f32 %v193_v6 }
 0x2a8   :  { %v2572_v7 = vpop.eup %2571 }
 0x2a9   :  { %v196_v8 = vmul.f32 %v2572_v7, %v180_v56 }
 0x2ab   :  { %v202_v12 = vmul.f32 %v2125_v9, %v196_v8 }
 0x2ac   :  { %v2574_v10 = vpop.eup %2573 }
 0x2ad   :  { %v197_v11 = vmul.f32 %v2574_v10, %v181_v55  ;;  %v2772_v15 = vadd.f32 %v2126_v13, %v202_v12 }
 0x2af   :  { %v203_v14 = vmul.f32 %v2125_v9, %v197_v11 }
 0x2b1   :  { %v2774_v16 = vadd.f32 %v2126_v13, %v203_v14 }
 0x2b3   :  { %v238_v17 = vpack.c.bf16 %v2774_v16, %v2772_v15 }
 0x2b5   :  { %2295 = vmatmul.mubr.msk.bf16.vlgmr.msra.gmra.mrb[0].mxu1 %vm170_vm3, %v238_v17 }
 0x2b6   :  { %2300 = vmatprep.mubr.msk.bf16.mxu1 %vm2689_vm4, %v2687_v18 }
 0x388   :  { %v292_v20 = vpop.f32.mrb[0].mxu1 }
 0x389   :  { %v2296_v21 = vpop.f32.mrb[1].mxu1  ;;  %v293_v23 = vadd.f32 %v2127_v19, %v292_v20 }
 0x38a   :  { %v295_v22 = vpop.f32.mrb[2].mxu1 }
 0x38b   :  { %v296_v24 = vadd.f32 %v2127_v19, %v295_v22  ;;  %v2297_v25 = vpop.f32.mrb[3].mxu1 }
 0x38d   :  { %v2781_v26 = vpack.c.bf16 %v296_v24, %v293_v23 }
 0x38f   :  { %430 = vrot.lane.b32.xlu0 %v2781_v26, %s2690_s5  ;;  %301 = vrot.lane.b32.xlu1 %v2781_v26, %s2691_s6 }
 0x393   :  { %549 = vrot.lane.b32.xlu0 %v2781_v26, %s2692_s7  ;;  %428 = vrot.lane.b32.xlu1 %v2781_v26, %s2693_s8 }
 0x397   :  { %670 = vrot.lane.b32.xlu0 %v2781_v26, %s2694_s9  ;;  %551 = vrot.lane.b32.xlu1 %v2781_v26, %s2695_s10 }
 0x39b   :  { %672 = vrot.lane.b32.xlu1 %v2781_v26, %s2696_s11  ;;  %305 = vrot.lane.b32.xlu0 %v2744_v2, %s2693_s8 }
 0x39f   :  { %303 = vrot.lane.b32.xlu1 %v2739_v1, %s2693_s8 }
 0x401   :  { %v302_v27 = vpop.permute.xlu1 %301  ;;  %v431_v29 = vpop.permute.xlu0 %430 }
 0x402   :  { %v314_v28 = vsel %vm309_vm5, %v302_v27, 0  ;;  %v436_v31 = vsel %vm309_vm5, %v431_v29, 0 }
 0x403   :  { %2299 = vmatpush3.bf16.xpose.msra.mxu1 %v314_v28 }
 0x404   :  { %2310 = vmatprep.subr.bf16.mxu1 %v2687_v18 }
 0x405   :  { %v429_v30 = vpop.permute.xlu1 %428  ;;  %v550_v33 = vpop.permute.xlu0 %549 }
 0x409   :  { %v552_v1 = vpop.permute.xlu1 %551  ;;  %v671_v35 = vpop.permute.xlu0 %670 }
 0x40a   :  { %2301 = vmatmul.mubr.msk.bf16.vlgmr.msra.gmra.mrb[4].mxu1 %vm309_vm5, %v2781_v26  ;;  %v557_v2 = vsel %vm309_vm5, %v552_v1, 0 }
 0x40b   :  { %2311 = vmatpush3.bf16.xpose.msra.mxu1 %v436_v31  ;;  %2312 = vmatprep.mubr.msk.bf16.mxu1 %vm2689_vm4, %v2687_v18 }
 0x40c   :  { %2322 = vmatprep.subr.bf16.mxu1 %v2687_v18 }
 0x40d   :  { %v673_v32 = vpop.permute.xlu1 %672  ;;  %v2824_v38 = vpop.permute.xlu0 %305 }
 0x40e   :  { %v678_v34 = vsel %vm309_vm5, %v673_v32, 0 }
 0x411   :  { %v2822_v36 = vpop.permute.xlu1 %303 }
 0x412   :  { %2313 = vmatmul.mubr.msk.bf16.vlgmr.msra.gmra.mrb[8].mxu1 %vm309_vm5, %v429_v30 }
 0x413   :  { %2323 = vmatpush3.bf16.xpose.msra.mxu1 %v557_v2  ;;  %2324 = vmatprep.mubr.msk.bf16.mxu1 %vm2689_vm4, %v2687_v18 }
 0x414   :  { %2334 = vmatprep.subr.bf16.mxu1 %v2687_v18 }
 0x41a   :  { %2325 = vmatmul.mubr.msk.bf16.vlgmr.msra.gmra.mrb[12].mxu1 %vm309_vm5, %v550_v33 }
 0x41b   :  { %2335 = vmatpush3.bf16.xpose.msra.mxu1 %v678_v34  ;;  %2336 = vmatprep.mubr.msk.bf16.mxu1 %vm2689_vm4, %v2687_v18 }
 0x41c   :  { %2346 = vmatprep.subr.bf16.mxu1 %v2687_v18 }
 0x422   :  { %2337 = vmatmul.mubr.msk.bf16.vlgmr.msra.gmra.mrb[16].mxu1 %vm309_vm5, %v671_v35 }
 0x423   :  { %2350 = vmatprep.mubr.msk.bf16.mxu1 %vm2689_vm4, %v2687_v18 }
 0x4dd   :  { %v350_v37 = vpop.f32.mrb[4].mxu1 }
 0x4de   :  { %v351_v39 = vadd.f32 %v350_v37, %v2822_v36  ;;  %v2302_v40 = vpop.f32.mrb[5].mxu1 }
 0x4df   :  { %v353_v41 = vpop.f32.mrb[6].mxu1 }
 0x4e0   :  { %v354_v42 = vadd.f32 %v353_v41, %v2824_v38  ;;  %v2303_v43 = vpop.f32.mrb[7].mxu1  ;;  %v358_v44 = vsel %vm357_vm6, %v351_v39, -inf }
 0x4e1   :  { %359 = vmax.xlane.f32.xlu1 %v358_v44 }
 0x4e2   :  { %v361_v45 = vsel %vm357_vm6, %v354_v42, -inf }
 0x4e3   :  { %362 = vmax.xlane.f32.xlu0 %v361_v45 }
 0x4e5   :  { %v472_v46 = vpop.f32.mrb[8].mxu1 }
 0x4e6   :  { %v473_v47 = vadd.f32 %v472_v46, %v2822_v36  ;;  %v2314_v48 = vpop.f32.mrb[9].mxu1 }
 0x4e7   :  { %v475_v49 = vpop.f32.mrb[10].mxu1 }
 0x4e8   :  { %v476_v50 = vadd.f32 %v475_v49, %v2824_v38  ;;  %v2315_v51 = vpop.f32.mrb[11].mxu1  ;;  %v479_v52 = vsel %vm357_vm6, %v473_v47, -inf }
 0x4e9   :  { %480 = vmax.xlane.f32.xlu0 %v479_v52 }
 0x4ea   :  { %v482_v53 = vsel %vm357_vm6, %v476_v50, -inf }
 0x4eb   :  { %483 = vmax.xlane.f32.xlu1 %v482_v53 }
 0x4ed   :  { %v593_v54 = vpop.f32.mrb[12].mxu1 }
 0x4ee   :  { %v594_v55 = vadd.f32 %v593_v54, %v2822_v36  ;;  %v2326_v56 = vpop.f32.mrb[13].mxu1 }
 0x4ef   :  { %v596_v57 = vpop.f32.mrb[14].mxu1 }
 0x4f0   :  { %v597_v58 = vadd.f32 %v596_v57, %v2824_v38  ;;  %v2327_v59 = vpop.f32.mrb[15].mxu1  ;;  %v600_v60 = vsel %vm357_vm6, %v594_v55, -inf }
 0x4f1   :  { %601 = vmax.xlane.f32.xlu0 %v600_v60 }
 0x4f2   :  { %v603_v61 = vsel %vm357_vm6, %v597_v58, -inf }
 0x4f3   :  { %604 = vmax.xlane.f32.xlu1 %v603_v61 }
 0x4f5   :  { %v714_v62 = vpop.f32.mrb[16].mxu1 }
 0x4f6   :  { %v715_v63 = vadd.f32 %v714_v62, %v2822_v36  ;;  %v2338_v0 = vpop.f32.mrb[17].mxu1 }
 0x4f7   :  { %v717_v3 = vpop.f32.mrb[18].mxu1 }
 0x4f8   :  { %v718_v4 = vadd.f32 %v717_v3, %v2824_v38  ;;  %v2339_v5 = vpop.f32.mrb[19].mxu1  ;;  %v721_v6 = vsel %vm357_vm6, %v715_v63, -inf }
 0x4f9   :  { %722 = vmax.xlane.f32.xlu0 %v721_v6 }
 0x4fa   :  { %v724_v7 = vsel %vm357_vm6, %v718_v4, -inf }
 0x4fb   :  { %725 = vmax.xlane.f32.xlu1 %v724_v7 }
 0x56e   :  { %v360_v8 = vpop.xlane.xlu1 %359 }
 0x56f   :  { %v364_v9 = vsub.f32 %v351_v39, %v360_v8 }
 0x570   :  { %v363_v10 = vpop.xlane.xlu0 %362 }
 0x571   :  { %v366_v11 = vmul.f32 1.442695, %v364_v9  ;;  %v365_v12 = vsub.f32 %v354_v42, %v363_v10 }
 0x573   :  { %2575 = vpow2.f32 %v366_v11  ;;  %v368_v13 = vmul.f32 1.442695, %v365_v12 }
 0x575   :  { %2577 = vpow2.f32 %v368_v13 }
 0x576   :  { %v481_v14 = vpop.xlane.xlu0 %480 }
 0x577   :  { %v485_v17 = vsub.f32 %v473_v47, %v481_v14 }
 0x578   :  { %v484_v27 = vpop.xlane.xlu1 %483 }
 0x579   :  { %v487_v19 = vmul.f32 1.442695, %v485_v17  ;;  %v486_v28 = vsub.f32 %v476_v50, %v484_v27 }
 0x57b   :  { %2579 = vpow2.f32 %v487_v19  ;;  %v489_v31 = vmul.f32 1.442695, %v486_v28 }
 0x57d   :  { %v2576_v20 = vpop.eup %2575  ;;  %2581 = vpow2.f32 %v489_v31 }
 0x57e   :  { %v370_v21 = vsel %vm357_vm6, %v2576_v20, 0.0  ;;  %v602_v30 = vpop.xlane.xlu0 %601 }
 0x57f   :  { %v2578_v22 = vpop.eup %2577  ;;  %371 = vadd.xlane.f32.xlu0 %v370_v21  ;;  %v606_v32 = vsub.f32 %v594_v55, %v602_v30 }
 0x580   :  { %v373_v23 = vsel %vm357_vm6, %v2578_v22, 0.0  ;;  %v605_v29 = vpop.xlane.xlu1 %604 }
 0x581   :  { %374 = vadd.xlane.f32.xlu1 %v373_v23  ;;  %v607_v1 = vsub.f32 %v597_v58, %v605_v29  ;;  %v608_v37 = vmul.f32 1.442695, %v606_v32 }
 0x583   :  { %v610_v34 = vmul.f32 1.442695, %v607_v1  ;;  %v2549_v1 = vld [vmem:[%s3136_s2 + $0x10] sm:$0xff]  }
 0x584   :  { %2347 = vmatpush3.bf16.msra.mxu1 %v2549_v1 }
 0x585   :  { %v2844_v24 = vpop.eup %2579  ;;  %2583 = vpow2.f32 %v610_v34  ;;  %2348 = vmatprep.subr.bf16.mxu1 %v2687_v18 }
 0x586   :  { %v491_v25 = vsel %vm357_vm6, %v2844_v24, 0.0  ;;  %v723_v33 = vpop.xlane.xlu0 %722  ;;  %2585 = vpow2.f32 %v608_v37 }
 0x587   :  { %492 = vadd.xlane.f32.xlu0 %v491_v25  ;;  %v727_v39 = vsub.f32 %v715_v63, %v723_v33  ;;  %v2582_v42 = vpop.eup %2581 }
 0x588   :  { %v726_v2 = vpop.xlane.xlu1 %725  ;;  %v494_v43 = vsel %vm357_vm6, %v2582_v42, 0.0 }
 0x589   :  { %v728_v35 = vsub.f32 %v718_v4, %v726_v2  ;;  %v729_v41 = vmul.f32 1.442695, %v727_v39 }
 0x58b   :  { %v731_v40 = vmul.f32 1.442695, %v728_v35  ;;  %v2550_v35 = vld [vmem:[%s3136_s2 + $0x18] sm:$0xff]  }
 0x58c   :  { %2349 = vmatpush3.bf16.msra.mxu1 %v2550_v35 }
 0x58d   :  { %2587 = vpow2.f32 %v731_v40  ;;  %2362 = vmatprep.subr.bf16.mxu1 %v2687_v18 }
 0x58e   :  { %2589 = vpow2.f32 %v729_v41 }
 0x58f   :  { %v2584_v44 = vpop.eup %2583 }
 0x590   :  { %v2586_v45 = vpop.eup %2585  ;;  %v615_v46 = vsel %vm357_vm6, %v2584_v44, 0.0 }
 0x591   :  { %v612_v48 = vsel %vm357_vm6, %v2586_v45, 0.0 }
 0x592   :  { %502 = vrot.lane.b32.xlu1 %v2781_v26, %s2697_s12 }
 0x597   :  { %v2854_v47 = vpop.eup %2587 }
 0x598   :  { %v2590_v49 = vpop.eup %2589  ;;  %v736_v50 = vsel %vm357_vm6, %v2854_v47, 0.0 }
 0x599   :  { %v733_v51 = vsel %vm357_vm6, %v2590_v49, 0.0 }
 0x59d   :  { %381 = vrot.lane.b32.xlu0 %v2781_v26, %s2698_s13 }
 0x5b6   :  { %495 = vadd.xlane.f32.xlu1 %v494_v43 }
 0x5ba   :  { %616 = vadd.xlane.f32.xlu1 %v615_v46 }
 0x5bc   :  { %613 = vadd.xlane.f32.xlu0 %v612_v48 }
 0x5be   :  { %737 = vadd.xlane.f32.xlu1 %v736_v50 }
 0x5c0   :  { %734 = vadd.xlane.f32.xlu0 %v733_v51 }
 0x5cf   :  { %623 = vrot.lane.b32.xlu1 %v2781_v26, %s2699_s14 }
 0x5d6   :  { %744 = vrot.lane.b32.xlu0 %v2781_v26, %s2700_s15 }
 0x60c   :  { %v372_v52 = vpop.xlane.xlu0 %371 }
 0x60d   :  { %2591 = vrcp.f32 %v372_v52 }
 0x60e   :  { %v375_v53 = vpop.xlane.xlu1 %374 }
 0x60f   :  { %2593 = vrcp.f32 %v375_v53 }
 0x612   :  { %v503_v61 = vpop.permute.xlu1 %502 }
 0x614   :  { %v493_v54 = vpop.xlane.xlu0 %492 }
 0x615   :  { %2595 = vrcp.f32 %v493_v54 }
 0x617   :  { %v2592_v55 = vpop.eup %2591 }
 0x618   :  { %v382_v56 = vpop.permute.xlu0 %381  ;;  %v378_v58 = vmul.f32 %v2592_v55, %v2576_v20 }
 0x619   :  { %v2594_v57 = vpop.eup %2593  ;;  %2305 = vmatpush3.bf16.msra.mxu0 %v382_v56 }
 0x61a   :  { %v379_v59 = vmul.f32 %v2594_v57, %v2578_v22  ;;  %2316 = vmatprep.subr.bf16.mxu0 %v2687_v18 }
 0x61c   :  { %v380_v60 = vpack.c.bf16 %v379_v59, %v378_v58 }
 0x61e   :  { %2307 = vmatmul.mubr.msk.bf16.vlgmr.msra.gmra.mrb[4].mxu0 %vm357_vm6, %v380_v60 }
 0x61f   :  { %2317 = vmatpush3.bf16.msra.mxu0 %v503_v61  ;;  %2318 = vmatprep.mubr.msk.bf16.mxu0 %vm2689_vm4, %v2687_v18  ;;  %v2596_v0 = vpop.eup %2595 }
 0x620   :  { %2328 = vmatprep.subr.bf16.mxu0 %v2687_v18  ;;  %v499_v6 = vmul.f32 %v2596_v0, %v2844_v24 }
 0x643   :  { %v496_v26 = vpop.xlane.xlu1 %495 }
 0x644   :  { %2597 = vrcp.f32 %v496_v26  ;;  %v2139_v26 = vld [vmem:[#allocation2 + $0x61] ss:$0 sm:$0xff] }
 0x647   :  { %v617_v62 = vpop.xlane.xlu1 %616 }
 0x648   :  { %2599 = vrcp.f32 %v617_v62 }
 0x649   :  { %v614_v63 = vpop.xlane.xlu0 %613 }
 0x64a   :  { %2601 = vrcp.f32 %v614_v63 }
 0x64b   :  { %v738_v3 = vpop.xlane.xlu1 %737 }
 0x64d   :  { %v735_v4 = vpop.xlane.xlu0 %734 }
 0x64e   :  { %v2598_v5 = vpop.eup %2597  ;;  %2603 = vrcp.f32 %v735_v4 }
 0x64f   :  { %v500_v7 = vmul.f32 %v2598_v5, %v2582_v42  ;;  %2605 = vrcp.f32 %v738_v3  ;;  %v624_v10 = vpop.permute.xlu1 %623 }
 0x651   :  { %v501_v8 = vpack.c.bf16 %v500_v7, %v499_v6  ;;  %v745_v19 = vpop.permute.xlu0 %744 }
 0x652   :  { %v2600_v9 = vpop.eup %2599 }
 0x653   :  { %2319 = vmatmul.mubr.msk.bf16.vlgmr.msra.gmra.mrb[8].mxu0 %vm357_vm6, %v501_v8  ;;  %v621_v13 = vmul.f32 %v2600_v9, %v2584_v44 }
 0x654   :  { %v2602_v11 = vpop.eup %2601  ;;  %2329 = vmatpush3.bf16.msra.mxu0 %v624_v10  ;;  %2330 = vmatprep.mubr.msk.bf16.mxu0 %vm2689_vm4, %v2687_v18 }
 0x655   :  { %v620_v12 = vmul.f32 %v2602_v11, %v2586_v45  ;;  %2340 = vmatprep.subr.bf16.mxu0 %v2687_v18 }
 0x657   :  { %v622_v14 = vpack.c.bf16 %v621_v13, %v620_v12 }
 0x658   :  { %v2604_v17 = vpop.eup %2603 }
 0x659   :  { %v2606_v20 = vpop.eup %2605  ;;  %v741_v21 = vmul.f32 %v2604_v17, %v2590_v49 }
 0x65a   :  { %v742_v22 = vmul.f32 %v2606_v20, %v2854_v47 }
 0x65b   :  { %2331 = vmatmul.mubr.msk.bf16.vlgmr.msra.gmra.mrb[12].mxu0 %vm357_vm6, %v622_v14 }
 0x65c   :  { %2341 = vmatpush3.bf16.msra.mxu0 %v745_v19  ;;  %2342 = vmatprep.mubr.msk.bf16.mxu0 %vm2689_vm4, %v2687_v18  ;;  %v743_v23 = vpack.c.bf16 %v742_v22, %v741_v21  ;;  %v2552_v22 = vld [vmem:[%s3136_s2 + $0x28] sm:$0xff]  }
 0x65d   :  { %2354 = vmatprep.subr.bf16.mxu0 %v2687_v18 }
 0x663   :  { %2343 = vmatmul.mubr.msk.bf16.vlgmr.msra.gmra.mrb[16].mxu0 %vm357_vm6, %v743_v23  ;;  %v2553_v23 = vld [vmem:[%s3136_s2 + $0x30] sm:$0xff]  }
 0x664   :  { %2358 = vmatprep.mubr.msk.bf16.mxu0 %vm2689_vm4, %v2687_v18 }
 0x6f1   :  { %v421_v24 = vpop.f32.mrb[4].mxu0 }
 0x6f2   :  { %v2308_v25 = vpop.f32.mrb[5].mxu0 }
 0x6f3   :  { %v424_v27 = vpop.f32.mrb[6].mxu0 }
 0x6f4   :  { %v2309_v28 = vpop.f32.mrb[7].mxu0 }
 0x726   :  { %v542_v29 = vpop.f32.mrb[8].mxu0 }
 0x727   :  { %v2320_v30 = vpop.f32.mrb[9].mxu0 }
 0x728   :  { %v545_v31 = vpop.f32.mrb[10].mxu0 }
 0x729   :  { %v2516_v2 = vpack.i.bf16 %v545_v31, %v542_v29  ;;  %v2321_v32 = vpop.f32.mrb[11].mxu0 }
 0x72a   :  { %v2143_v32 = vld [vmem:[#allocation2 + $0x62] ss:$0 sm:$0xff] }
 0x72b   :  { %2517 = vrot.lane.b32.xlu1 %v2516_v2, %s2685_s23 }
 0x72e   :  { %v663_v33 = vpop.f32.mrb[12].mxu0 }
 0x72f   :  { %v2332_v34 = vpop.f32.mrb[13].mxu0 }
 0x730   :  { %v666_v37 = vpop.f32.mrb[14].mxu0 }
 0x731   :  { %v2521_v39 = vpack.i.bf16 %v666_v37, %v663_v33  ;;  %v2333_v40 = vpop.f32.mrb[15].mxu0  ;;  %v2144_v37 = vld [vmem:[#allocation2 + $0x63] ss:$0 sm:$0xff] }
 0x733   :  { %2522 = vrot.lane.b32.xlu0 %v2521_v39, %s2701_s20 }
 0x736   :  { %v784_v41 = vpop.f32.mrb[16].mxu0 }
 0x737   :  { %v2344_v42 = vpop.f32.mrb[17].mxu0 }
 0x738   :  { %v787_v43 = vpop.f32.mrb[18].mxu0 }
 0x739   :  { %v2526_v44 = vpack.i.bf16 %v787_v43, %v784_v41  ;;  %v2345_v45 = vpop.f32.mrb[19].mxu0  ;;  %v2555_v43 = vld [vmem:[%s3136_s2 + $0x40] sm:$0xff]  }
 0x73a   :  { %v2145_v45 = vld [vmem:[#allocation2 + $0x64] ss:$0 sm:$0xff] }
 0x73b   :  { %2527 = vrot.lane.b32.xlu1 %v2526_v44, %s2702_s21  ;;  %v2556_v44 = vld [vmem:[%s3136_s2 + $0x48] sm:$0xff]  }
 0x79d   :  { %v2518_v46 = vpop.permute.xlu1 %2517 }
 0x79e   :  { %v2520_v48 = vunpack.i.h.bf16 %v2518_v46  ;;  %v2519_v49 = vunpack.i.l.bf16 %v2518_v46 }
 0x7a0   :  { %v816_v53 = vsel %vm309_vm5, %v424_v27, %v2520_v48  ;;  %v815_v54 = vsel %vm309_vm5, %v421_v24, %v2519_v49  ;;  %v2554_v24 = vld [vmem:[%s3136_s2 + $0x38] sm:$0xff]  }
 0x7a5   :  { %v2523_v47 = vpop.permute.xlu0 %2522 }
 0x7a6   :  { %v2525_v50 = vunpack.i.h.bf16 %v2523_v47  ;;  %v2524_v51 = vunpack.i.l.bf16 %v2523_v47 }
 0x7a8   :  { %v817_v57 = vsel %vm357_vm6, %v815_v54, %v2524_v51  ;;  %v818_v58 = vsel %vm357_vm6, %v816_v53, %v2525_v50 }
 0x7ad   :  { %v2528_v52 = vpop.permute.xlu1 %2527 }
 0x7ae   :  { %v2530_v55 = vunpack.i.h.bf16 %v2528_v52  ;;  %v2529_v56 = vunpack.i.l.bf16 %v2528_v52 }
 0x7b0   :  { %v820_v59 = vsel %vm819_vm7, %v817_v57, %v2529_v56  ;;  %v821_v60 = vsel %vm819_vm7, %v818_v58, %v2530_v55  ;;  %v2149_v55 = vld [vmem:[#allocation2 + $0x65] ss:$0 sm:$0xff] }
 0x7b1   :  { %v822_v61 = vpack.c.bf16 %v821_v60, %v820_v59 }
 0x7b3   :  { %2351 = vmatmul.mubr.msk.bf16.vlgmr.msra.gmra.mrb[20].mxu1 %vm170_vm3, %v822_v61 }
 0x7b4   :  { %2370 = vmatprep.mubr.msk.bf16.mxu1 %vm2689_vm4, %v2687_v18  ;;  %2363 = vmatpush3.bf16.msra.mxu1 %v2553_v23  ;;  %v2155_v23 = vld [vmem:[#allocation2 + $0x66] ss:$0 sm:$0xff] }
 0x7b5   :  { %2364 = vmatprep.subr.bf16.mxu1 %v2687_v18 }
 0x7b8   :  { %2365 = vmatpush3.bf16.msra.mxu1 %v2554_v24 }
 0x7b9   :  { %2366 = vmatprep.subr.bf16.mxu1 %v2687_v18 }
 0x7bc   :  { %2367 = vmatpush3.bf16.msra.mxu1 %v2555_v43 }
 0x7bd   :  { %2368 = vmatprep.subr.bf16.mxu1 %v2687_v18 }
 0x7c0   :  { %2369 = vmatpush3.bf16.msra.mxu1 %v2556_v44 }
 0x7c1   :  { %2388 = vmatprep.subr.bf16.mxu1 %v2687_v18 }
 0x886   :  { %v876_v62 = vpop.f32.mrb[20].mxu1 }
 0x887   :  { %v877_v63 = vadd.f32 %v2139_v26, %v876_v62  ;;  %v2352_v0 = vpop.f32.mrb[21].mxu1 }
 0x888   :  { %v879_v3 = vpop.f32.mrb[22].mxu1 }
 0x889   :  { %v880_v4 = vadd.f32 %v2139_v26, %v879_v3  ;;  %v2353_v5 = vpop.f32.mrb[23].mxu1  ;;  %v883_v6 = vadd.f32 %v877_v63, %v2772_v15 }
 0x88b   :  { %v885_v7 = vsel %vm170_vm3, %v883_v6, 0.0  ;;  %v884_v8 = vadd.f32 %v880_v4, %v2774_v16  ;;  %v2551_v16 = vld [vmem:[%s3136_s2 + $0x20] sm:$0xff]  }
 0x88c   :  { %886 = vadd.xlane.f32.xlu0 %v885_v7  ;;  %2355 = vmatpush3.bf16.msra.mxu0 %v2551_v16 }
 0x88d   :  { %v888_v9 = vsel %vm170_vm3, %v884_v8, 0.0  ;;  %2356 = vmatprep.subr.bf16.mxu0 %v2687_v18 }
 0x88e   :  { %889 = vadd.xlane.f32.xlu1 %v888_v9 }
 0x890   :  { %2357 = vmatpush3.bf16.msra.mxu0 %v2552_v22 }
 0x891   :  { %2374 = vmatprep.subr.bf16.mxu0 %v2687_v18 }
 0x919   :  { %v887_v10 = vpop.xlane.xlu0 %886 }
 0x91a   :  { %v891_v11 = vmul.f32 0.03125, %v887_v10 }
 0x91b   :  { %v890_v12 = vpop.xlane.xlu1 %889 }
 0x91c   :  { %v893_v13 = vsub.f32 %v883_v6, %v891_v11  ;;  %v892_v14 = vmul.f32 0.03125, %v890_v12 }
 0x91e   :  { %v894_v17 = vsub.f32 %v884_v8, %v892_v14  ;;  %v895_v19 = vmul.f32 %v893_v13, %v893_v13  ;;  %v2558_v14 = vld [vmem:[%s3136_s2 + $0x58] sm:$0xff]  }
 0x920   :  { %v897_v20 = vsel %vm170_vm3, %v895_v19, 0.0  ;;  %v896_v21 = vmul.f32 %v894_v17, %v894_v17 }
 0x921   :  { %898 = vadd.xlane.f32.xlu0 %v897_v20 }
 0x922   :  { %v900_v15 = vsel %vm170_vm3, %v896_v21, 0.0 }
 0x925   :  { %901 = vadd.xlane.f32.xlu0 %v900_v15 }
 0x9ae   :  { %v899_v25 = vpop.xlane.xlu0 %898 }
 0x9af   :  { %v903_v27 = vmul.f32 0.03125, %v899_v25 }
 0x9b1   :  { %v905_v28 = vadd.f32 1e-12, %v903_v27 }
 0x9b2   :  { %v902_v29 = vpop.xlane.xlu0 %901 }
 0x9b3   :  { %2607 = vrsqrt.f32 %v905_v28  ;;  %v904_v30 = vmul.f32 0.03125, %v902_v29  ;;  %v2156_v29 = vld [vmem:[#allocation2 + $0x67] ss:$0 sm:$0xff] }
 0x9b5   :  { %v906_v31 = vadd.f32 1e-12, %v904_v30 }
 0x9b7   :  { %2609 = vrsqrt.f32 %v906_v31 }
 0x9bd   :  { %v2608_v1 = vpop.eup %2607 }
 0x9be   :  { %v909_v2 = vmul.f32 %v2608_v1, %v893_v13  ;;  %v2557_v13 = vld [vmem:[%s3136_s2 + $0x50] sm:$0xff]  }
 0x9c0   :  { %v915_v34 = vmul.f32 %v2143_v32, %v909_v2 }
 0x9c1   :  { %v2610_v33 = vpop.eup %2609 }
 0x9c2   :  { %v910_v35 = vmul.f32 %v2610_v33, %v894_v17  ;;  %v921_v40 = vadd.f32 %v2144_v37, %v915_v34 }
 0x9c4   :  { %v916_v39 = vmul.f32 %v2143_v32, %v910_v35  ;;  %v2157_v32 = vld [vmem:[#allocation2 + $0x68] ss:$0 sm:$0xff] }
 0x9c6   :  { %v922_v41 = vadd.f32 %v2144_v37, %v916_v39 }
 0x9c8   :  { %v923_v42 = vpack.c.bf16 %v922_v41, %v921_v40 }
 0x9ca   :  { %2359 = vmatmul.mubr.msk.bf16.vlgmr.msra.gmra.mrb[20].mxu0 %vm170_vm3, %v923_v42 }
 0x9cb   :  { %2378 = vmatprep.mubr.msk.bf16.mxu0 %vm2689_vm4, %v2687_v18  ;;  %2375 = vmatpush3.bf16.msra.mxu0 %v2557_v13 }
 0x9cc   :  { %2376 = vmatprep.subr.bf16.mxu0 %v2687_v18 }
 0x9cf   :  { %2377 = vmatpush3.bf16.msra.mxu0 %v2558_v14 }
 0x9d0   :  { %2382 = vmatprep.subr.bf16.mxu0 %v2687_v18 }
 0xa9d   :  { %v977_v46 = vpop.f32.mrb[20].mxu0 }
 0xa9e   :  { %v978_v47 = vadd.f32 %v2145_v45, %v977_v46  ;;  %v2360_v48 = vpop.f32.mrb[21].mxu0 }
 0xa9f   :  { %v980_v49 = vpop.f32.mrb[22].mxu0 }
 0xaa0   :  { %v981_v50 = vadd.f32 %v2145_v45, %v980_v49  ;;  %v2361_v51 = vpop.f32.mrb[23].mxu0  ;;  %v984_v52 = vmax.f32 %v978_v47, 0.0 }
 0xaa2   :  { %v985_v53 = vmax.f32 %v981_v50, 0.0 }
 0xaa4   :  { %v986_v54 = vpack.c.bf16 %v985_v53, %v984_v52 }
 0xaa6   :  { %2371 = vmatmul.mubr.msk.bf16.vlgmr.msra.gmra.mrb[24].mxu1 %vm86_vm0, %v986_v54 }
 0xaa7   :  { %2390 = vmatprep.mubr.msk.bf16.mxu1 %vm2689_vm4, %v2687_v18 }
 0xb79   :  { %v1052_v56 = vpop.f32.mrb[24].mxu1 }
 0xb7a   :  { %v1053_v57 = vadd.f32 %v2149_v55, %v1052_v56  ;;  %v2372_v58 = vpop.f32.mrb[25].mxu1 }
 0xb7b   :  { %v1055_v59 = vpop.f32.mrb[26].mxu1 }
 0xb7c   :  { %v1056_v60 = vadd.f32 %v2149_v55, %v1055_v59  ;;  %v2373_v61 = vpop.f32.mrb[27].mxu1  ;;  %v1059_v26 = vadd.f32 %v1053_v57, %v921_v40 }
 0xb7e   :  { %v1061_v62 = vsel %vm170_vm3, %v1059_v26, 0.0  ;;  %v1060_v63 = vadd.f32 %v1056_v60, %v922_v41 }
 0xb7f   :  { %1062 = vadd.xlane.f32.xlu1 %v1061_v62 }
 0xb80   :  { %v1064_v0 = vsel %vm170_vm3, %v1060_v63, 0.0 }
 0xb81   :  { %1065 = vadd.xlane.f32.xlu0 %v1064_v0 }
 0xc0c   :  { %v1063_v3 = vpop.xlane.xlu1 %1062 }
 0xc0d   :  { %v1067_v4 = vmul.f32 0.03125, %v1063_v3 }
 0xc0e   :  { %v1066_v5 = vpop.xlane.xlu0 %1065 }
 0xc0f   :  { %v1069_v6 = vsub.f32 %v1059_v26, %v1067_v4  ;;  %v1068_v7 = vmul.f32 0.03125, %v1066_v5 }
 0xc11   :  { %v1070_v8 = vsub.f32 %v1060_v63, %v1068_v7  ;;  %v1071_v9 = vmul.f32 %v1069_v6, %v1069_v6 }
 0xc13   :  { %v1073_v10 = vsel %vm170_vm3, %v1071_v9, 0.0  ;;  %v1072_v11 = vmul.f32 %v1070_v8, %v1070_v8 }
 0xc14   :  { %1074 = vadd.xlane.f32.xlu1 %v1073_v10 }
 0xc15   :  { %v1076_v12 = vsel %vm170_vm3, %v1072_v11, 0.0 }
 0xc16   :  { %1077 = vadd.xlane.f32.xlu0 %v1076_v12 }
 0xca1   :  { %v1075_v17 = vpop.xlane.xlu1 %1074 }
 0xca2   :  { %v1079_v19 = vmul.f32 0.03125, %v1075_v17 }
 0xca3   :  { %v1078_v20 = vpop.xlane.xlu0 %1077 }
 0xca4   :  { %v1081_v21 = vadd.f32 1e-12, %v1079_v19  ;;  %v1080_v15 = vmul.f32 0.03125, %v1078_v20 }
 0xca6   :  { %2611 = vrsqrt.f32 %v1081_v21  ;;  %v1082_v16 = vadd.f32 1e-12, %v1080_v15 }
 0xca8   :  { %2613 = vrsqrt.f32 %v1082_v16 }
 0xcb0   :  { %v2612_v22 = vpop.eup %2611 }
 0xcb1   :  { %v1085_v24 = vmul.f32 %v2612_v22, %v1069_v6 }
 0xcb2   :  { %v2614_v25 = vpop.eup %2613 }
 0xcb3   :  { %v1091_v27 = vmul.f32 %v2155_v23, %v1085_v24  ;;  %v1086_v28 = vmul.f32 %v2614_v25, %v1070_v8 }
 0xcb5   :  { %v1092_v30 = vmul.f32 %v2155_v23, %v1086_v28  ;;  %v2950_v31 = vadd.f32 %v2156_v29, %v1091_v27 }
 0xcb7   :  { %v2952_v1 = vadd.f32 %v2156_v29, %v1092_v30 }
 0xcb9   :  { %v1127_v2 = vpack.c.bf16 %v2952_v1, %v2950_v31 }
 0xcbb   :  { %2379 = vmatmul.mubr.msk.bf16.vlgmr.msra.gmra.mrb[24].mxu0 %vm170_vm3, %v1127_v2 }
 0xcbc   :  { %2384 = vmatprep.mubr.msk.bf16.mxu0 %vm2689_vm4, %v2687_v18 }
 0xd8e   :  { %v1181_v33 = vpop.f32.mrb[24].mxu0 }
 0xd8f   :  { %v2380_v34 = vpop.f32.mrb[25].mxu0  ;;  %v1182_v37 = vadd.f32 %v2157_v32, %v1181_v33 }
 0xd90   :  { %v1184_v35 = vpop.f32.mrb[26].mxu0 }
 0xd91   :  { %v1185_v39 = vadd.f32 %v2157_v32, %v1184_v35  ;;  %v2381_v40 = vpop.f32.mrb[27].mxu0 }
 0xd93   :  { %v2959_v41 = vpack.c.bf16 %v1185_v39, %v1182_v37 }
 0xd95   :  { %1311 = vrot.lane.b32.xlu0 %v2959_v41, %s2690_s5  ;;  %1190 = vrot.lane.b32.xlu1 %v2959_v41, %s2691_s6 }
 0xd99   :  { %1430 = vrot.lane.b32.xlu0 %v2959_v41, %s2692_s7  ;;  %1309 = vrot.lane.b32.xlu1 %v2959_v41, %s2693_s8 }
 0xd9d   :  { %1551 = vrot.lane.b32.xlu0 %v2959_v41, %s2694_s9  ;;  %1432 = vrot.lane.b32.xlu1 %v2959_v41, %s2695_s10 }
 0xda1   :  { %1553 = vrot.lane.b32.xlu1 %v2959_v41, %s2696_s11 }
 0xe07   :  { %v1191_v42 = vpop.permute.xlu1 %1190  ;;  %v1312_v44 = vpop.permute.xlu0 %1311 }
 0xe08   :  { %v1196_v43 = vsel %vm309_vm5, %v1191_v42, 0  ;;  %v1317_v46 = vsel %vm309_vm5, %v1312_v44, 0 }
 0xe09   :  { %2383 = vmatpush3.bf16.xpose.msra.mxu0 %v1196_v43 }
 0xe0a   :  { %2394 = vmatprep.subr.bf16.mxu0 %v2687_v18 }
 0xe0b   :  { %v1310_v45 = vpop.permute.xlu1 %1309  ;;  %v1431_v50 = vpop.permute.xlu0 %1430 }
 0xe0f   :  { %v1433_v47 = vpop.permute.xlu1 %1432  ;;  %v1552_v52 = vpop.permute.xlu0 %1551 }
 0xe10   :  { %2385 = vmatmul.mubr.msk.bf16.vlgmr.msra.gmra.mrb[28].mxu0 %vm309_vm5, %v2959_v41  ;;  %v1438_v48 = vsel %vm309_vm5, %v1433_v47, 0 }
 0xe11   :  { %2395 = vmatpush3.bf16.xpose.msra.mxu0 %v1317_v46  ;;  %2396 = vmatprep.mubr.msk.bf16.mxu0 %vm2689_vm4, %v2687_v18 }
 0xe12   :  { %2406 = vmatprep.subr.bf16.mxu0 %v2687_v18 }
 0xe13   :  { %v1554_v49 = vpop.permute.xlu1 %1553 }
 0xe14   :  { %v1559_v51 = vsel %vm309_vm5, %v1554_v49, 0 }
 0xe18   :  { %2397 = vmatmul.mubr.msk.bf16.vlgmr.msra.gmra.mrb[32].mxu0 %vm309_vm5, %v1310_v45 }
 0xe19   :  { %2407 = vmatpush3.bf16.xpose.msra.mxu0 %v1438_v48  ;;  %2408 = vmatprep.mubr.msk.bf16.mxu0 %vm2689_vm4, %v2687_v18 }
 0xe1a   :  { %2418 = vmatprep.subr.bf16.mxu0 %v2687_v18 }
 0xe20   :  { %2409 = vmatmul.mubr.msk.bf16.vlgmr.msra.gmra.mrb[36].mxu0 %vm309_vm5, %v1431_v50 }
 0xe21   :  { %2419 = vmatpush3.bf16.xpose.msra.mxu0 %v1559_v51  ;;  %2420 = vmatprep.mubr.msk.bf16.mxu0 %vm2689_vm4, %v2687_v18 }
 0xe22   :  { %2430 = vmatprep.subr.bf16.mxu0 %v2687_v18 }
 0xe28   :  { %2421 = vmatmul.mubr.msk.bf16.vlgmr.msra.gmra.mrb[40].mxu0 %vm309_vm5, %v1552_v52 }
 0xe29   :  { %2434 = vmatprep.mubr.msk.bf16.mxu0 %vm2689_vm4, %v2687_v18 }
 0xee3   :  { %v1232_v53 = vpop.f32.mrb[28].mxu0 }
 0xee4   :  { %v1233_v54 = vadd.f32 %v1232_v53, %v2822_v36  ;;  %v2386_v55 = vpop.f32.mrb[29].mxu0 }
 0xee5   :  { %v1235_v56 = vpop.f32.mrb[30].mxu0 }
 0xee6   :  { %v1236_v57 = vadd.f32 %v1235_v56, %v2824_v38  ;;  %v2387_v58 = vpop.f32.mrb[31].mxu0  ;;  %v1239_v59 = vsel %vm357_vm6, %v1233_v54, -inf }
 0xee7   :  { %1240 = vmax.xlane.f32.xlu1 %v1239_v59 }
 0xee8   :  { %v1242_v60 = vsel %vm357_vm6, %v1236_v57, -inf }
 0xee9   :  { %1243 = vmax.xlane.f32.xlu0 %v1242_v60 }
 0xeeb   :  { %v1353_v61 = vpop.f32.mrb[32].mxu0 }
 0xeec   :  { %v1354_v26 = vadd.f32 %v1353_v61, %v2822_v36  ;;  %v2398_v62 = vpop.f32.mrb[33].mxu0 }
 0xeed   :  { %v1356_v63 = vpop.f32.mrb[34].mxu0 }
 0xeee   :  { %v1357_v0 = vadd.f32 %v1356_v63, %v2824_v38  ;;  %v2399_v3 = vpop.f32.mrb[35].mxu0  ;;  %v1360_v4 = vsel %vm357_vm6, %v1354_v26, -inf }
 0xeef   :  { %1361 = vmax.xlane.f32.xlu0 %v1360_v4 }
 0xef0   :  { %v1363_v5 = vsel %vm357_vm6, %v1357_v0, -inf }
 0xef1   :  { %1364 = vmax.xlane.f32.xlu1 %v1363_v5 }
 0xef3   :  { %v1474_v6 = vpop.f32.mrb[36].mxu0 }
 0xef4   :  { %v1475_v7 = vadd.f32 %v1474_v6, %v2822_v36  ;;  %v2410_v8 = vpop.f32.mrb[37].mxu0 }
 0xef5   :  { %v1477_v9 = vpop.f32.mrb[38].mxu0 }
 0xef6   :  { %v1478_v10 = vadd.f32 %v1477_v9, %v2824_v38  ;;  %v2411_v11 = vpop.f32.mrb[39].mxu0  ;;  %v1481_v12 = vsel %vm357_vm6, %v1475_v7, -inf }
 0xef7   :  { %1482 = vmax.xlane.f32.xlu0 %v1481_v12 }
 0xef8   :  { %v1484_v13 = vsel %vm357_vm6, %v1478_v10, -inf }
 0xef9   :  { %1485 = vmax.xlane.f32.xlu1 %v1484_v13 }
 0xefb   :  { %v1595_v14 = vpop.f32.mrb[40].mxu0 }
 0xefc   :  { %v1596_v17 = vadd.f32 %v1595_v14, %v2822_v36  ;;  %v2422_v19 = vpop.f32.mrb[41].mxu0 }
 0xefd   :  { %v1598_v20 = vpop.f32.mrb[42].mxu0 }
 0xefe   :  { %v1599_v21 = vadd.f32 %v1598_v20, %v2824_v38  ;;  %v2423_v15 = vpop.f32.mrb[43].mxu0  ;;  %v1602_v16 = vsel %vm357_vm6, %v1596_v17, -inf }
 0xeff   :  { %1603 = vmax.xlane.f32.xlu0 %v1602_v16 }
 0xf00   :  { %v1605_v22 = vsel %vm357_vm6, %v1599_v21, -inf }
 0xf01   :  { %1606 = vmax.xlane.f32.xlu1 %v1605_v22 }
 0xf74   :  { %v1241_v23 = vpop.xlane.xlu1 %1240 }
 0xf75   :  { %v1245_v24 = vsub.f32 %v1233_v54, %v1241_v23 }
 0xf76   :  { %v1244_v25 = vpop.xlane.xlu0 %1243 }
 0xf77   :  { %v1247_v27 = vmul.f32 1.442695, %v1245_v24  ;;  %v1246_v28 = vsub.f32 %v1236_v57, %v1244_v25 }
 0xf79   :  { %2615 = vpow2.f32 %v1247_v27  ;;  %v1249_v29 = vmul.f32 1.442695, %v1246_v28 }
 0xf7b   :  { %2617 = vpow2.f32 %v1249_v29 }
 0xf7c   :  { %v1362_v36 = vpop.xlane.xlu0 %1361 }
 0xf7d   :  { %v1366_v30 = vsub.f32 %v1354_v26, %v1362_v36 }
 0xf7e   :  { %v1365_v39 = vpop.xlane.xlu1 %1364 }
 0xf7f   :  { %v1368_v2 = vmul.f32 1.442695, %v1366_v30  ;;  %v1367_v40 = vsub.f32 %v1357_v0, %v1365_v39 }
 0xf81   :  { %2619 = vpow2.f32 %v1368_v2  ;;  %v1370_v44 = vmul.f32 1.442695, %v1367_v40 }
 0xf83   :  { %v2616_v38 = vpop.eup %2615  ;;  %2621 = vpow2.f32 %v1370_v44 }
 0xf84   :  { %v1251_v32 = vsel %vm357_vm6, %v2616_v38, 0.0  ;;  %v1483_v43 = vpop.xlane.xlu0 %1482 }
 0xf85   :  { %v2618_v33 = vpop.eup %2617  ;;  %1252 = vadd.xlane.f32.xlu0 %v1251_v32  ;;  %v1487_v47 = vsub.f32 %v1475_v7, %v1483_v43  ;;  %v2559_v43 = vld [vmem:[%s3136_s2 + $0x60] sm:$0xff]  }
 0xf86   :  { %v1254_v34 = vsel %vm357_vm6, %v2618_v33, 0.0  ;;  %v1486_v42 = vpop.xlane.xlu1 %1485  ;;  %2431 = vmatpush3.bf16.msra.mxu0 %v2559_v43  ;;  %v2173_v43 = vld [vmem:[#allocation2 + $0x6a] ss:$0 sm:$0xff] }
 0xf87   :  { %1255 = vadd.xlane.f32.xlu1 %v1254_v34  ;;  %v1488_v45 = vsub.f32 %v1478_v10, %v1486_v42  ;;  %v1489_v51 = vmul.f32 1.442695, %v1487_v47  ;;  %2432 = vmatprep.subr.bf16.mxu0 %v2687_v18 }
 0xf89   :  { %v1491_v49 = vmul.f32 1.442695, %v1488_v45 }
 0xf8b   :  { %v3014_v35 = vpop.eup %2619  ;;  %2623 = vpow2.f32 %v1491_v49 }
 0xf8c   :  { %v1372_v37 = vsel %vm357_vm6, %v3014_v35, 0.0  ;;  %v1604_v48 = vpop.xlane.xlu0 %1603  ;;  %2625 = vpow2.f32 %v1489_v51 }
 0xf8d   :  { %1373 = vadd.xlane.f32.xlu0 %v1372_v37  ;;  %v1608_v52 = vsub.f32 %v1596_v17, %v1604_v48  ;;  %v2622_v55 = vpop.eup %2621  ;;  %v2560_v48 = vld [vmem:[%s3136_s2 + $0x68] sm:$0xff]  }
 0xf8e   :  { %v1607_v46 = vpop.xlane.xlu1 %1606  ;;  %v1375_v56 = vsel %vm357_vm6, %v2622_v55, 0.0  ;;  %2433 = vmatpush3.bf16.msra.mxu0 %v2560_v48 }
 0xf8f   :  { %v1609_v50 = vsub.f32 %v1599_v21, %v1607_v46  ;;  %v1610_v54 = vmul.f32 1.442695, %v1608_v52  ;;  %2446 = vmatprep.subr.bf16.mxu0 %v2687_v18 }
 0xf91   :  { %v1612_v53 = vmul.f32 1.442695, %v1609_v50 }
 0xf93   :  { %2627 = vpow2.f32 %v1612_v53 }
 0xf94   :  { %2629 = vpow2.f32 %v1610_v54 }
 0xf95   :  { %v2624_v57 = vpop.eup %2623 }
 0xf96   :  { %v2626_v58 = vpop.eup %2625  ;;  %v1496_v59 = vsel %vm357_vm6, %v2624_v57, 0.0 }
 0xf97   :  { %v1493_v61 = vsel %vm357_vm6, %v2626_v58, 0.0 }
 0xf98   :  { %1383 = vrot.lane.b32.xlu1 %v2959_v41, %s2697_s12 }
 0xf9d   :  { %v3024_v60 = vpop.eup %2627 }
 0xf9e   :  { %v2630_v26 = vpop.eup %2629  ;;  %v1617_v62 = vsel %vm357_vm6, %v3024_v60, 0.0 }
 0xf9f   :  { %v1614_v63 = vsel %vm357_vm6, %v2630_v26, 0.0 }
 0xfa3   :  { %1262 = vrot.lane.b32.xlu0 %v2959_v41, %s2698_s13 }
 0xfbc   :  { %1376 = vadd.xlane.f32.xlu1 %v1375_v56 }
 0xfc0   :  { %1497 = vadd.xlane.f32.xlu1 %v1496_v59 }
 0xfc2   :  { %1494 = vadd.xlane.f32.xlu0 %v1493_v61 }
 0xfc4   :  { %1618 = vadd.xlane.f32.xlu1 %v1617_v62 }
 0xfc6   :  { %1615 = vadd.xlane.f32.xlu0 %v1614_v63 }
 0xfd5   :  { %1504 = vrot.lane.b32.xlu1 %v2959_v41, %s2699_s14 }
 0xfdc   :  { %1625 = vrot.lane.b32.xlu0 %v2959_v41, %s2700_s15 }
0x1012   :  { %v1253_v0 = vpop.xlane.xlu0 %1252 }
0x1013   :  { %2631 = vrcp.f32 %v1253_v0 }
0x1014   :  { %v1256_v3 = vpop.xlane.xlu1 %1255 }
0x1015   :  { %2633 = vrcp.f32 %v1256_v3 }
0x1018   :  { %v1384_v11 = vpop.permute.xlu1 %1383 }
0x101a   :  { %v1374_v4 = vpop.xlane.xlu0 %1373 }
0x101b   :  { %2635 = vrcp.f32 %v1374_v4 }
0x101d   :  { %v2632_v5 = vpop.eup %2631 }
0x101e   :  { %v1263_v6 = vpop.permute.xlu0 %1262  ;;  %v1259_v8 = vmul.f32 %v2632_v5, %v2616_v38 }
0x101f   :  { %v2634_v7 = vpop.eup %2633  ;;  %2389 = vmatpush3.bf16.msra.mxu1 %v1263_v6 }
0x1020   :  { %v1260_v9 = vmul.f32 %v2634_v7, %v2618_v33  ;;  %2400 = vmatprep.subr.bf16.mxu1 %v2687_v18 }
0x1022   :  { %v1261_v10 = vpack.c.bf16 %v1260_v9, %v1259_v8 }
0x1024   :  { %2391 = vmatmul.mubr.msk.bf16.vlgmr.msra.gmra.mrb[28].mxu1 %vm357_vm6, %v1261_v10  ;;  %v2169_v10 = vld [vmem:[#allocation2 + $0x69] ss:$0 sm:$0xff] }
0x1025   :  { %2401 = vmatpush3.bf16.msra.mxu1 %v1384_v11  ;;  %2402 = vmatprep.mubr.msk.bf16.mxu1 %vm2689_vm4, %v2687_v18  ;;  %v2636_v14 = vpop.eup %2635 }
0x1026   :  { %2412 = vmatprep.subr.bf16.mxu1 %v2687_v18  ;;  %v1380_v21 = vmul.f32 %v2636_v14, %v3014_v35 }
0x1049   :  { %v1377_v41 = vpop.xlane.xlu1 %1376 }
0x104a   :  { %2637 = vrcp.f32 %v1377_v41 }
0x104d   :  { %v1498_v12 = vpop.xlane.xlu1 %1497 }
0x104e   :  { %2639 = vrcp.f32 %v1498_v12 }
0x104f   :  { %v1495_v13 = vpop.xlane.xlu0 %1494 }
0x1050   :  { %2641 = vrcp.f32 %v1495_v13 }
0x1051   :  { %v1619_v17 = vpop.xlane.xlu1 %1618 }
0x1053   :  { %v1616_v19 = vpop.xlane.xlu0 %1615 }
0x1054   :  { %v2638_v20 = vpop.eup %2637  ;;  %2643 = vrcp.f32 %v1616_v19 }
0x1055   :  { %v1381_v15 = vmul.f32 %v2638_v20, %v2622_v55  ;;  %2645 = vrcp.f32 %v1619_v17  ;;  %v1505_v23 = vpop.permute.xlu1 %1504 }
0x1057   :  { %v1382_v16 = vpack.c.bf16 %v1381_v15, %v1380_v21  ;;  %v1626_v36 = vpop.permute.xlu0 %1625 }
0x1058   :  { %v2640_v22 = vpop.eup %2639 }
0x1059   :  { %2403 = vmatmul.mubr.msk.bf16.vlgmr.msra.gmra.mrb[32].mxu1 %vm357_vm6, %v1382_v16  ;;  %v1502_v27 = vmul.f32 %v2640_v22, %v2624_v57 }
0x105a   :  { %v2642_v24 = vpop.eup %2641  ;;  %2413 = vmatpush3.bf16.msra.mxu1 %v1505_v23  ;;  %2414 = vmatprep.mubr.msk.bf16.mxu1 %vm2689_vm4, %v2687_v18 }
0x105b   :  { %v1501_v25 = vmul.f32 %v2642_v24, %v2626_v58  ;;  %2424 = vmatprep.subr.bf16.mxu1 %v2687_v18 }
0x105d   :  { %v1503_v28 = vpack.c.bf16 %v1502_v27, %v1501_v25 }
0x105e   :  { %v2644_v29 = vpop.eup %2643 }
0x105f   :  { %v2646_v30 = vpop.eup %2645  ;;  %v1622_v2 = vmul.f32 %v2644_v29, %v2630_v26 }
0x1060   :  { %v1623_v38 = vmul.f32 %v2646_v30, %v3024_v60  ;;  %v2562_v30 = vld [vmem:[%s3136_s2 + $0x78] sm:$0xff]  }
0x1061   :  { %2415 = vmatmul.mubr.msk.bf16.vlgmr.msra.gmra.mrb[36].mxu1 %vm357_vm6, %v1503_v28 }
0x1062   :  { %2425 = vmatpush3.bf16.msra.mxu1 %v1626_v36  ;;  %2426 = vmatprep.mubr.msk.bf16.mxu1 %vm2689_vm4, %v2687_v18  ;;  %v1624_v32 = vpack.c.bf16 %v1623_v38, %v1622_v2  ;;  %v2563_v2 = vld [vmem:[%s3136_s2 + $0x80] sm:$0xff]   ;;  %v2564_v38 = vld [vmem:[%s3136_s2 + $0x88] sm:$0xff]  }
0x1063   :  { %2438 = vmatprep.subr.bf16.mxu1 %v2687_v18 }
0x1069   :  { %2427 = vmatmul.mubr.msk.bf16.vlgmr.msra.gmra.mrb[40].mxu1 %vm357_vm6, %v1624_v32 }
0x106a   :  { %2442 = vmatprep.mubr.msk.bf16.mxu1 %vm2689_vm4, %v2687_v18 }
0x10f7   :  { %v1302_v33 = vpop.f32.mrb[28].mxu1 }
0x10f8   :  { %v2392_v34 = vpop.f32.mrb[29].mxu1 }
0x10f9   :  { %v1305_v35 = vpop.f32.mrb[30].mxu1 }
0x10fa   :  { %v2393_v37 = vpop.f32.mrb[31].mxu1 }
0x112c   :  { %v1423_v39 = vpop.f32.mrb[32].mxu1 }
0x112d   :  { %v2404_v40 = vpop.f32.mrb[33].mxu1 }
0x112e   :  { %v1426_v42 = vpop.f32.mrb[34].mxu1 }
0x112f   :  { %v2531_v44 = vpack.i.bf16 %v1426_v42, %v1423_v39  ;;  %v2405_v45 = vpop.f32.mrb[35].mxu1 }
0x1131   :  { %2532 = vrot.lane.b32.xlu1 %v2531_v44, %s2685_s23 }
0x1134   :  { %v1544_v46 = vpop.f32.mrb[36].mxu1 }
0x1135   :  { %v2416_v47 = vpop.f32.mrb[37].mxu1 }
0x1136   :  { %v1547_v49 = vpop.f32.mrb[38].mxu1  ;;  %v2174_v47 = vld [vmem:[#allocation2 + $0x6b] ss:$0 sm:$0xff] }
0x1137   :  { %v2536_v50 = vpack.i.bf16 %v1547_v49, %v1544_v46  ;;  %v2417_v51 = vpop.f32.mrb[39].mxu1 }
0x1139   :  { %2537 = vrot.lane.b32.xlu0 %v2536_v50, %s2701_s20 }
0x113c   :  { %v1665_v52 = vpop.f32.mrb[40].mxu1 }
0x113d   :  { %v2428_v53 = vpop.f32.mrb[41].mxu1 }
0x113e   :  { %v1668_v54 = vpop.f32.mrb[42].mxu1  ;;  %v2566_v53 = vld [vmem:[%s3136_s2 + $0x98] sm:$0xff]  }
0x113f   :  { %v2541_v55 = vpack.i.bf16 %v1668_v54, %v1665_v52  ;;  %v2429_v56 = vpop.f32.mrb[43].mxu1  ;;  %v2565_v52 = vld [vmem:[%s3136_s2 + $0x90] sm:$0xff]   ;;  %v2175_v54 = vld [vmem:[#allocation2 + $0x6c] ss:$0 sm:$0xff] }
0x1141   :  { %2542 = vrot.lane.b32.xlu1 %v2541_v55, %s2702_s21 }
0x11a3   :  { %v2533_v57 = vpop.permute.xlu1 %2532 }
0x11a4   :  { %v2535_v59 = vunpack.i.h.bf16 %v2533_v57  ;;  %v2534_v60 = vunpack.i.l.bf16 %v2533_v57 }
0x11a6   :  { %v1697_v63 = vsel %vm309_vm5, %v1305_v35, %v2535_v59  ;;  %v1696_v0 = vsel %vm309_vm5, %v1302_v33, %v2534_v60 }
0x11ab   :  { %v2538_v58 = vpop.permute.xlu0 %2537 }
0x11ac   :  { %v2540_v61 = vunpack.i.h.bf16 %v2538_v58  ;;  %v2539_v26 = vunpack.i.l.bf16 %v2538_v58 }
0x11ae   :  { %v1699_v5 = vsel %vm357_vm6, %v1697_v63, %v2540_v61  ;;  %v1698_v6 = vsel %vm357_vm6, %v1696_v0, %v2539_v26  ;;  %v2179_v63 = vld [vmem:[#allocation2 + $0x6d] ss:$0 sm:$0xff] }
0x11b3   :  { %v2543_v62 = vpop.permute.xlu1 %2542 }
0x11b4   :  { %v2545_v3 = vunpack.i.h.bf16 %v2543_v62  ;;  %v2544_v4 = vunpack.i.l.bf16 %v2543_v62 }
0x11b6   :  { %v1701_v7 = vsel %vm819_vm7, %v1699_v5, %v2545_v3  ;;  %v1700_v8 = vsel %vm819_vm7, %v1698_v6, %v2544_v4 }
0x11b7   :  { %v1702_v9 = vpack.c.bf16 %v1701_v7, %v1700_v8 }
0x11b9   :  { %2435 = vmatmul.mubr.msk.bf16.vlgmr.msra.gmra.mrb[44].mxu0 %vm170_vm3, %v1702_v9 }
0x11ba   :  { %2454 = vmatprep.mubr.msk.bf16.mxu0 %vm2689_vm4, %v2687_v18  ;;  %2447 = vmatpush3.bf16.msra.mxu0 %v2563_v2 }
0x11bb   :  { %2448 = vmatprep.subr.bf16.mxu0 %v2687_v18 }
0x11be   :  { %2449 = vmatpush3.bf16.msra.mxu0 %v2564_v38 }
0x11bf   :  { %2450 = vmatprep.subr.bf16.mxu0 %v2687_v18 }
0x11c2   :  { %2451 = vmatpush3.bf16.msra.mxu0 %v2565_v52 }
0x11c3   :  { %2452 = vmatprep.subr.bf16.mxu0 %v2687_v18 }
0x11c6   :  { %2453 = vmatpush3.bf16.msra.mxu0 %v2566_v53  ;;  %v2191_v53 = vld [vmem:[#allocation2 + $0x71] ss:$0 sm:$0xff] }
0x128c   :  { %v1756_v11 = vpop.f32.mrb[44].mxu0 }
0x128d   :  { %v1757_v41 = vadd.f32 %v2169_v10, %v1756_v11  ;;  %v2436_v12 = vpop.f32.mrb[45].mxu0 }
0x128e   :  { %v1759_v13 = vpop.f32.mrb[46].mxu0 }
0x128f   :  { %v1760_v14 = vadd.f32 %v2169_v10, %v1759_v13  ;;  %v2437_v17 = vpop.f32.mrb[47].mxu0  ;;  %v1763_v19 = vadd.f32 %v1757_v41, %v2950_v31 }
0x1291   :  { %v1765_v20 = vsel %vm170_vm3, %v1763_v19, 0.0  ;;  %v1764_v21 = vadd.f32 %v1760_v14, %v2952_v1  ;;  %v2561_v1 = vld [vmem:[%s3136_s2 + $0x70] sm:$0xff]  }
0x1292   :  { %1766 = vadd.xlane.f32.xlu0 %v1765_v20  ;;  %2439 = vmatpush3.bf16.msra.mxu1 %v2561_v1  ;;  %v2185_v1 = vld [vmem:[#allocation2 + $0x6e] ss:$0 sm:$0xff] }
0x1293   :  { %v1768_v15 = vsel %vm170_vm3, %v1764_v21, 0.0  ;;  %2440 = vmatprep.subr.bf16.mxu1 %v2687_v18 }
0x1294   :  { %1769 = vadd.xlane.f32.xlu1 %v1768_v15 }
0x1296   :  { %2441 = vmatpush3.bf16.msra.mxu1 %v2562_v30 }
0x1297   :  { %2458 = vmatprep.subr.bf16.mxu1 %v2687_v18 }
0x131f   :  { %v1767_v16 = vpop.xlane.xlu0 %1766 }
0x1320   :  { %v1771_v22 = vmul.f32 0.03125, %v1767_v16 }
0x1321   :  { %v1770_v23 = vpop.xlane.xlu1 %1769 }
0x1322   :  { %v1773_v24 = vsub.f32 %v1763_v19, %v1771_v22  ;;  %v1772_v25 = vmul.f32 0.03125, %v1770_v23  ;;  %v2567_v22 = vld [vmem:[%s3136_s2 + $0xa0] sm:$0xff]   ;;  %v2568_v23 = vld [vmem:[%s3136_s2 + $0xa8] sm:$0xff]  }
0x1324   :  { %v1774_v27 = vsub.f32 %v1764_v21, %v1772_v25  ;;  %v1775_v28 = vmul.f32 %v1773_v24, %v1773_v24 }
0x1326   :  { %v1777_v29 = vsel %vm170_vm3, %v1775_v28, 0.0  ;;  %v1776_v36 = vmul.f32 %v1774_v27, %v1774_v27 }
0x1327   :  { %1778 = vadd.xlane.f32.xlu0 %v1777_v29 }
0x1328   :  { %v1780_v31 = vsel %vm170_vm3, %v1776_v36, 0.0 }
0x132b   :  { %1781 = vadd.xlane.f32.xlu0 %v1780_v31 }
0x13b4   :  { %v1779_v32 = vpop.xlane.xlu0 %1778 }
0x13b5   :  { %v1783_v33 = vmul.f32 0.03125, %v1779_v32 }
0x13b7   :  { %v1785_v34 = vadd.f32 1e-12, %v1783_v33  ;;  %v2186_v33 = vld [vmem:[#allocation2 + $0x6f] ss:$0 sm:$0xff] }
0x13b8   :  { %v1782_v35 = vpop.xlane.xlu0 %1781 }
0x13b9   :  { %2647 = vrsqrt.f32 %v1785_v34  ;;  %v1784_v37 = vmul.f32 0.03125, %v1782_v35 }
0x13bb   :  { %v1786_v39 = vadd.f32 1e-12, %v1784_v37 }
0x13bd   :  { %2649 = vrsqrt.f32 %v1786_v39 }
0x13c3   :  { %v2648_v40 = vpop.eup %2647 }
0x13c4   :  { %v1789_v42 = vmul.f32 %v2648_v40, %v1773_v24  ;;  %v2569_v40 = vld [vmem:[%s3136_s2 + $0xb0] sm:$0xff]  }
0x13c6   :  { %v1795_v45 = vmul.f32 %v2173_v43, %v1789_v42  ;;  %v2570_v42 = vld [vmem:[%s3136_s2 + $0xb8] sm:$0xff]  }
0x13c7   :  { %v2650_v44 = vpop.eup %2649 }
0x13c8   :  { %v1790_v46 = vmul.f32 %v2650_v44, %v1774_v27  ;;  %v1801_v49 = vadd.f32 %v2174_v47, %v1795_v45 }
0x13ca   :  { %v1796_v48 = vmul.f32 %v2173_v43, %v1790_v46  ;;  %v2187_v43 = vld [vmem:[#allocation2 + $0x70] ss:$0 sm:$0xff] }
0x13cc   :  { %v1802_v50 = vadd.f32 %v2174_v47, %v1796_v48 }
0x13ce   :  { %v1803_v51 = vpack.c.bf16 %v1802_v50, %v1801_v49 }
0x13d0   :  { %2443 = vmatmul.mubr.msk.bf16.vlgmr.msra.gmra.mrb[44].mxu1 %vm170_vm3, %v1803_v51 }
0x13d1   :  { %2462 = vmatprep.mubr.msk.bf16.mxu1 %vm2689_vm4, %v2687_v18  ;;  %2459 = vmatpush3.bf16.msra.mxu1 %v2567_v22 }
0x13d2   :  { %2460 = vmatprep.subr.bf16.mxu1 %v2687_v18 }
0x13d5   :  { %2461 = vmatpush3.bf16.msra.mxu1 %v2568_v23 }
0x13d6   :  { %2466 = vmatprep.subr.bf16.mxu1 %v2687_v18 }
0x14a3   :  { %v1857_v55 = vpop.f32.mrb[44].mxu1 }
0x14a4   :  { %v1858_v56 = vadd.f32 %v2175_v54, %v1857_v55  ;;  %v2444_v57 = vpop.f32.mrb[45].mxu1 }
0x14a5   :  { %v1860_v58 = vpop.f32.mrb[46].mxu1 }
0x14a6   :  { %v1861_v59 = vadd.f32 %v2175_v54, %v1860_v58  ;;  %v2445_v60 = vpop.f32.mrb[47].mxu1  ;;  %v1864_v61 = vmax.f32 %v1858_v56, 0.0 }
0x14a8   :  { %v1865_v26 = vmax.f32 %v1861_v59, 0.0 }
0x14aa   :  { %v1866_v62 = vpack.c.bf16 %v1865_v26, %v1864_v61 }
0x14ac   :  { %2455 = vmatmul.mubr.msk.bf16.vlgmr.msra.gmra.mrb[48].mxu0 %vm86_vm0, %v1866_v62 }
0x157f   :  { %v1932_v0 = vpop.f32.mrb[48].mxu0 }
0x1580   :  { %v1933_v3 = vadd.f32 %v2179_v63, %v1932_v0  ;;  %v2456_v4 = vpop.f32.mrb[49].mxu0 }
0x1581   :  { %v1935_v5 = vpop.f32.mrb[50].mxu0 }
0x1582   :  { %v1936_v6 = vadd.f32 %v2179_v63, %v1935_v5  ;;  %v2457_v7 = vpop.f32.mrb[51].mxu0  ;;  %v1939_v8 = vadd.f32 %v1933_v3, %v1801_v49 }
0x1584   :  { %v1941_v9 = vsel %vm170_vm3, %v1939_v8, 0.0  ;;  %v1940_v10 = vadd.f32 %v1936_v6, %v1802_v50 }
0x1585   :  { %1942 = vadd.xlane.f32.xlu1 %v1941_v9 }
0x1586   :  { %v1944_v11 = vsel %vm170_vm3, %v1940_v10, 0.0 }
0x1587   :  { %1945 = vadd.xlane.f32.xlu0 %v1944_v11 }
0x1612   :  { %v1943_v41 = vpop.xlane.xlu1 %1942 }
0x1613   :  { %v1947_v12 = vmul.f32 0.03125, %v1943_v41 }
0x1614   :  { %v1946_v13 = vpop.xlane.xlu0 %1945 }
0x1615   :  { %v1949_v14 = vsub.f32 %v1939_v8, %v1947_v12  ;;  %v1948_v17 = vmul.f32 0.03125, %v1946_v13 }
0x1617   :  { %v1950_v19 = vsub.f32 %v1940_v10, %v1948_v17  ;;  %v1951_v20 = vmul.f32 %v1949_v14, %v1949_v14 }
0x1619   :  { %v1953_v21 = vsel %vm170_vm3, %v1951_v20, 0.0  ;;  %v1952_v15 = vmul.f32 %v1950_v19, %v1950_v19 }
0x161a   :  { %1954 = vadd.xlane.f32.xlu1 %v1953_v21 }
0x161b   :  { %v1956_v16 = vsel %vm170_vm3, %v1952_v15, 0.0 }
0x161c   :  { %1957 = vadd.xlane.f32.xlu0 %v1956_v16 }
0x16a7   :  { %v1955_v24 = vpop.xlane.xlu1 %1954 }
0x16a8   :  { %v1959_v25 = vmul.f32 0.03125, %v1955_v24 }
0x16a9   :  { %v1958_v27 = vpop.xlane.xlu0 %1957 }
0x16aa   :  { %v1961_v28 = vadd.f32 1e-12, %v1959_v25  ;;  %v1960_v29 = vmul.f32 0.03125, %v1958_v27 }
0x16ac   :  { %2651 = vrsqrt.f32 %v1961_v28  ;;  %v1962_v36 = vadd.f32 1e-12, %v1960_v29 }
0x16ae   :  { %2653 = vrsqrt.f32 %v1962_v36 }
0x16b6   :  { %v2652_v31 = vpop.eup %2651 }
0x16b7   :  { %v1965_v30 = vmul.f32 %v2652_v31, %v1949_v14 }
0x16b8   :  { %v2654_v2 = vpop.eup %2653 }
0x16b9   :  { %v1971_v38 = vmul.f32 %v2185_v1, %v1965_v30  ;;  %v1966_v32 = vmul.f32 %v2654_v2, %v1950_v19 }
0x16bb   :  { %v1972_v34 = vmul.f32 %v2185_v1, %v1966_v32  ;;  %v1977_v35 = vadd.f32 %v2186_v33, %v1971_v38 }
0x16bd   :  { %v1978_v37 = vadd.f32 %v2186_v33, %v1972_v34 }
0x16bf   :  { %v1989_v39 = vpack.c.bf16 %v1978_v37, %v1977_v35 }
0x16c1   :  { %2463 = vmatmul.mubr.msk.bf16.vlgmr.msra.gmra.mrb[48].mxu1 %vm170_vm3, %v1989_v39 }
0x16c2   :  { %2470 = vmatprep.mubr.msk.bf16.mxu1 %vm2689_vm4, %v2687_v18  ;;  %2467 = vmatpush3.bf16.msra.mxu1 %v2569_v40 }
0x16c3   :  { %2468 = vmatprep.subr.bf16.mxu1 %v2687_v18 }
0x16c6   :  { %2469 = vmatpush3.bf16.msra.mxu1 %v2570_v42 }
0x1794   :  { %v2043_v44 = vpop.f32.mrb[48].mxu1 }
0x1795   :  { %v2044_v45 = vadd.f32 %v2187_v43, %v2043_v44  ;;  %v2464_v46 = vpop.f32.mrb[49].mxu1 }
0x1796   :  { %v2046_v47 = vpop.f32.mrb[50].mxu1 }
0x1797   :  { %v2047_v48 = vadd.f32 %v2187_v43, %v2046_v47  ;;  %v2465_v49 = vpop.f32.mrb[51].mxu1  ;;  %2655 = vtanh.f32 %v2044_v45 }
0x1799   :  { %2657 = vtanh.f32 %v2047_v48 }
0x17a1   :  { %v2656_v50 = vpop.eup %2655 }
0x17a3   :  { %v2658_v51 = vpop.eup %2657 }
0x17a4   :  { %v2052_v52 = vpack.c.bf16 %v2658_v51, %v2656_v50 }
0x17a6   :  { %2471 = vmatmul.mubr.msk.bf16.vlgmr.msra.gmra.mrb[52].mxu1 %vm170_vm3, %v2052_v52 }
0x1879   :  { %v2106_v54 = vpop.f32.mrb[52].mxu1 }
0x187a   :  { %v2107_v55 = vadd.f32 %v2191_v53, %v2106_v54  ;;  %v2472_v18 = vpop.f32.mrb[53].mxu1 }
0x187b   :  { %v2109_v56 = vpop.f32.mrb[54].mxu1 }
0x187c   :  { %2114 = vst.msk [vmem:[%s3137_s3] sm:$0xff] %vm2113_vm8, %v2107_v55  ;;  %v2110_v57 = vadd.f32 %v2191_v53, %v2109_v56  ;;  %v2473_v58 = vpop.f32.mrb[55].mxu1 }
0x187e   :  { %2115 = vst.msk [vmem:[%s3137_s3 + $0x8] sm:$0xff] %vm2113_vm8, %v2110_v57 }
0x187f   :  { %2120 = vsyncpa [#allocation3], 1 }

</bundles_post_ra>
